<compile_context>
chip_gen: v7x
topology: tpu7x:2x2x1
jax: 0.10.0
libtpu: 0.0.40
codegen_flags: <defaults>
</compile_context>

<pallas_src>
import numpy as np

import jax
import jax.numpy as jnp
from jax import lax
from jax.experimental import pallas as pl
from jax.experimental.pallas import tpu as pltpu

GEMM_DTYPE = jnp.bfloat16   # MXU operand dtype (accumulation is always f32).

# Lane-layout constants (all chosen so every lane slice is 128-aligned).
C1P = 16                    # conv1 out-channels padded 12 -> 16
C2P = 32                    # conv2 out-channels padded 24 -> 32
N1B = 256                   # conv1 per-pool-col-tap lane block (12*C1P=192 live)
N2B = 128                   # conv2 per-pool-col-tap lane block ( 4*C2P=128 live)


# ------------------------------ Pallas kernel ------------------------------- #

def _customnet_kernel(x_ref, w1b_ref, b1_ref, w2b_ref, b2_ref,
                      wf1_ref, bf1_ref, wf2_ref, bf2_ref, wf3_ref, bf3_ref,
                      o_ref):
    """Whole CustomNet forward for one image, entirely on-chip.

    x_ref : (1, 4, 7, 28) bf16, row-phase-split image: x_ref[0,k,i,j] = x[4i+k, j].
    w1b   : (5, 28, 512)  banded conv1 weight, N cols = (v, q, c) with c padded to 16.
    w2b   : (5, 256, 256) banded conv2 weight, K = (wq, ci), N = (v, qq, co) co pad 32.
    wf1   : (4, 128, 128) fc1 weight split per pooled row pp (flatten perm baked in).
    """
    f32 = jnp.float32

    # The 4 row-phase planes of this image (tiny: 4 x (7, 28) bf16).
    xph = [x_ref[0, k] for k in range(4)]

    # ---- conv1 + bias + ReLU + 2x2 maxpool (banded-over-width GEMMs) -------- #
    # acc[a][u][i, v*N1B + q*C1P + c] = conv1(x)[2*(2i+a)+u, 2q+v, c]
    acc = [[jnp.zeros((6, 2 * N1B), f32) for _ in range(2)] for _ in range(2)]
    for di in range(5):                     # conv kernel row offset
        w = w1b_ref[di]                     # (28, 512) bf16, loaded once per di
        for a in range(2):                  # output (pooled1) row phase
            for u in range(2):              # pool row tap
                s = 2 * a + u + di          # image row = 4*i + s
                lhs = xph[s % 4][s // 4:s // 4 + 6, :]          # (6, 28) contiguous
                acc[a][u] += jnp.dot(lhs, w, preferred_element_type=f32)
    # pooled1, kept row-phase split for conv2: a1[a][i, q*C1P+c] = pooled1[2i+a, q, c]
    a1 = []
    for a in range(2):
        t = jnp.maximum(acc[a][0], acc[a][1])            # max over pool row tap u
        m = jnp.maximum(t[:, :N1B], t[:, N1B:])          # max over pool col tap v
        a1.append(jnp.maximum(m + b1_ref[...], 0.0).astype(GEMM_DTYPE))   # (6, 256)

    # ---- conv2 + bias + ReLU + 2x2 maxpool ---------------------------------- #
    # acc2[u][pp, v*N2B + qq*C2P + co] = conv2(pooled1)[2*pp+u, 2qq+v, co]
    acc2 = [jnp.zeros((4, 2 * N2B), f32) for _ in range(2)]
    for di in range(5):
        w = w2b_ref[di]                     # (256, 256) bf16
        for u in range(2):
            s = u + di                      # pooled1 row = 2*pp + s
            lhs = a1[s % 2][s // 2:s // 2 + 4, :]               # (4, 256) contiguous
            acc2[u] += jnp.dot(lhs, w, preferred_element_type=f32)
    t2 = jnp.maximum(acc2[0], acc2[1])                   # max over u
    m2 = jnp.maximum(t2[:, :N2B], t2[:, N2B:])           # max over v -> (4, 128)
    p2 = jnp.maximum(m2 + b2_ref[...], 0.0).astype(GEMM_DTYPE)  # lanes = qq*32 + co

    # ---- fc1 + ReLU (accumulate over the 4 pooled rows; no flatten needed) -- #
    h = bf1_ref[...]                                     # (1, 128) f32
    for pp in range(4):
        h = h + jnp.dot(p2[pp:pp + 1, :], wf1_ref[pp], preferred_element_type=f32)
    a3 = jnp.maximum(h, 0.0).astype(GEMM_DTYPE)

    # ---- fc2 + ReLU, fc3 ----------------------------------------------------- #
    h = jnp.dot(a3, wf2_ref[...], preferred_element_type=f32) + bf2_ref[...]
    a4 = jnp.maximum(h, 0.0).astype(GEMM_DTYPE)
    o_ref[0] = (jnp.dot(a4, wf3_ref[...], preferred_element_type=f32)
                + bf3_ref[...])                          # (1, 128), lanes 10..127 == 0


# ------------------------------ pallas_call wrapper ------------------------- #

def _resident_spec(shape):
    """Full-array block that never changes with the grid index (weights/biases)."""
    n = len(shape)
    return pl.BlockSpec(shape, lambda b, _n=n: (0,) * _n)


def customnet_pallas(xph, pp):
    B = xph.shape[0]
    w_specs = [
        _resident_spec(pp["w1b"].shape), _resident_spec(pp["b1t"].shape),
        _resident_spec(pp["w2b"].shape), _resident_spec(pp["b2t"].shape),
        _resident_spec(pp["wf1"].shape), _resident_spec(pp["bf1"].shape),
        _resident_spec(pp["wf2"].shape), _resident_spec(pp["bf2"].shape),
        _resident_spec(pp["wf3"].shape), _resident_spec(pp["bf3"].shape),
    ]
    return pl.pallas_call(
        _customnet_kernel,
        out_shape=jax.ShapeDtypeStruct((B, 1, 128), jnp.float32),
        grid=(B,),
        in_specs=[pl.BlockSpec((1, 4, 7, 28), lambda b: (b, 0, 0, 0))] + w_specs,
        out_specs=pl.BlockSpec((1, 1, 128), lambda b: (b, 0, 0)),
        compiler_params=pltpu.CompilerParams(
            dimension_semantics=("parallel",)),          # v7x: both TensorCores
    )(xph, pp["w1b"], pp["b1t"], pp["w2b"], pp["b2t"],
      pp["wf1"], pp["bf1"], pp["wf2"], pp["bf2"], pp["wf3"], pp["bf3"])


@jax.jit
def custom_net_forward(x_nchw, pp):
    """Exact CustomNet.forward semantics. x_nchw: (B, 1, 28, 28) f32 -> (B, 10)."""
    B = x_nchw.shape[0]
    # Row-phase split (4i + k): a byte-neutral reshape/transpose so that every
    # in-kernel conv access is a contiguous static slice (no strided gathers).
    xph = (x_nchw[:, 0].reshape(B, 7, 4, 28).transpose(0, 2, 1, 3)
           .astype(GEMM_DTYPE))                          # (B, 4, 7, 28)
    logits = customnet_pallas(xph, pp)                    # (B, 1, 128)
    return logits[:, 0, :10]


# ------------------------ one-time weight preparation ------------------------ #

def prepare_params(p):
    """Pack PyTorch-layout weights into banded, lane-aligned GEMM matrices.

    conv weights become width-banded (Toeplitz) matrices so the convs run as
    dense GEMMs directly on the image rows (no im2col); the 2x2 pool's column
    tap and the NCHW flatten permutation before fc1 are baked into the weights.
    """
    w1 = np.asarray(p["w1"], np.float32)     # (12, 1, 5, 5)
    b1 = np.asarray(p["b1"], np.float32)
    w2 = np.asarray(p["w2"], np.float32)     # (24, 12, 5, 5)
    b2 = np.asarray(p["b2"], np.float32)
    wf1 = np.asarray(p["w_fc1"], np.float32)  # (120, 384), feature = c*16 + h*4 + w
    bf1 = np.asarray(p["b_fc1"], np.float32)
    wf2 = np.asarray(p["w_fc2"], np.float32)  # (84, 120)
    bf2 = np.asarray(p["b_fc2"], np.float32)
    wf3 = np.asarray(p["w_fc3"], np.float32)  # (10, 84)
    bf3 = np.asarray(p["b_fc3"], np.float32)

    # conv1 banded weight: [di, j, v*N1B + q*C1P + c] = w1[c, 0, di, j - (2q+v)]
    w1b = np.zeros((5, 28, 2 * N1B), np.float32)
    for di in range(5):
        for q in range(12):
            for v in range(2):
                for dj in range(5):
                    j = 2 * q + v + dj
                    base = v * N1B + q * C1P
                    w1b[di, j, base:base + 12] = w1[:, 0, di, dj]
    b1t = np.zeros((1, N1B), np.float32)
    for q in range(12):
        b1t[0, q * C1P:q * C1P + 12] = b1

    # conv2 banded weight: [di, wq*C1P + ci, v*N2B + qq*C2P + co]
    #                       = w2[co, ci, di, wq - (2qq+v)]
    w2b = np.zeros((5, N1B, 2 * N2B), np.float32)
    for di in range(5):
        for qq in range(4):
            for v in range(2):
                for dj in range(5):
                    wq = 2 * qq + v + dj
                    base = v * N2B + qq * C2P
                    for ci in range(12):
                        w2b[di, wq * C1P + ci, base:base + 24] = w2[:, ci, di, dj]
    b2t = np.zeros((1, N2B), np.float32)
    for qq in range(4):
        b2t[0, qq * C2P:qq * C2P + 24] = b2

    # fc1: [pp, qq*C2P + co, n] = w_fc1[n, co*16 + pp*4 + qq]  (flatten perm baked in)
    wf1b = np.zeros((4, 128, 128), np.float32)
    for pp in range(4):
        for qq in range(4):
            for co in range(24):
                wf1b[pp, qq * C2P + co, :120] = wf1[:, co * 16 + pp * 4 + qq]
    bf1b = np.zeros((1, 128), np.float32); bf1b[0, :120] = bf1

    wf2b = np.zeros((128, 128), np.float32); wf2b[:120, :84] = wf2.T
    bf2b = np.zeros((1, 128), np.float32); bf2b[0, :84] = bf2
    wf3b = np.zeros((128, 128), np.float32); wf3b[:84, :10] = wf3.T
    bf3b = np.zeros((1, 128), np.float32); bf3b[0, :10] = bf3

    as_bf16 = lambda a: jnp.asarray(a, GEMM_DTYPE)
    as_f32 = lambda a: jnp.asarray(a, jnp.float32)
    return {
        "w1b": as_bf16(w1b), "b1t": as_f32(b1t),
        "w2b": as_bf16(w2b), "b2t": as_f32(b2t),
        "wf1": as_bf16(wf1b), "bf1": as_f32(bf1b),
        "wf2": as_bf16(wf2b), "bf2": as_f32(bf2b),
        "wf3": as_bf16(wf3b), "bf3": as_f32(bf3b),
    }


# ------------------------- pure-JAX reference check -------------------------- #

def reference_forward(x, p, gemm_dtype=jnp.float32):
    """Structurally independent reference (lax.conv / reduce_window / dense)."""
    def conv(x, w, b):
        y = lax.conv_general_dilated(
            x.astype(gemm_dtype), w.astype(gemm_dtype), (1, 1), "VALID",
            dimension_numbers=("NCHW", "OIHW", "NCHW"),
            preferred_element_type=jnp.float32)
        return jax.nn.relu(y + b.reshape(1, -1, 1, 1))

    def pool(x):
        return lax.reduce_window(
            x, -jnp.inf, lax.max, (1, 1, 2, 2), (1, 1, 2, 2), "VALID")

    def dense(a, w, b):
        return jnp.dot(a.astype(gemm_dtype), w.T.astype(gemm_dtype),
                       preferred_element_type=jnp.float32) + b

    x = pool(conv(x, p["w1"], p["b1"]))
    x = pool(conv(x, p["w2"], p["b2"]))
    x = x.reshape(x.shape[0], -1)
    x = jax.nn.relu(dense(x, p["w_fc1"], p["b_fc1"]))
    x = jax.nn.relu(dense(x, p["w_fc2"], p["b_fc2"]))
    return dense(x, p["w_fc3"], p["b_fc3"])


# ----------------------------------- main ------------------------------------ #

def init_params(key):
    ks = jax.random.split(key, 10)
    s = 0.1
    return {
        "w1": s * jax.random.normal(ks[0], (12, 1, 5, 5), jnp.float32),
        "b1": s * jax.random.normal(ks[1], (12,), jnp.float32),
        "w2": s * jax.random.normal(ks[2], (24, 12, 5, 5), jnp.float32),
        "b2": s * jax.random.normal(ks[3], (24,), jnp.float32),
        "w_fc1": s * jax.random.normal(ks[4], (120, 24 * 4 * 4), jnp.float32),
        "b_fc1": s * jax.random.normal(ks[5], (120,), jnp.float32),
        "w_fc2": s * jax.random.normal(ks[6], (84, 120), jnp.float32),
        "b_fc2": s * jax.random.normal(ks[7], (84,), jnp.float32),
        "w_fc3": s * jax.random.normal(ks[8], (10, 84), jnp.float32),
        "b_fc3": s * jax.random.normal(ks[9], (10,), jnp.float32),
    }


if __name__ == "__main__":
    key = jax.random.PRNGKey(0)
    k_x, k_p = jax.random.split(key)
    # 28x28 spatial is implied by fc1 expecting 24*4*4 features; small batch=2.
    x = jax.random.normal(k_x, (2, 1, 28, 28), jnp.float32)
    params = init_params(k_p)
    prepped = prepare_params(params)          # one-time, hoisted out of forward

    out = jax.block_until_ready(custom_net_forward(x, prepped))
    assert out.shape == (2, 10), out.shape

    # Apples-to-apples correctness: reference with the same bf16-operand /
    # f32-accumulate GEMM precision the kernel uses.
    ref_matched = jax.block_until_ready(reference_forward(x, params, GEMM_DTYPE))
    assert jnp.allclose(out, ref_matched, rtol=1e-2, atol=1e-2), (
        float(jnp.max(jnp.abs(out - ref_matched))))

    # Sanity check vs the pure-f32 reference (bf16 operand rounding gives ~1%
    # differences by design, so the tolerance here is loose).
    ref_f32 = jax.block_until_ready(reference_forward(x, params, jnp.float32))
    assert jnp.allclose(out, ref_f32, rtol=1e-1, atol=1e-1), (
        float(jnp.max(jnp.abs(out - ref_f32))))

    print("KERNEL_OK")
</pallas_src>

<mosaic_0001>
module attributes {stable_mosaic.version = 11 : i64} {
  func.func @_customnet_kernel(%arg0: i32, %arg1: memref<1x4x7x28xbf16, #tpu.memory_space<vmem>>, %arg2: memref<5x28x512xbf16, #tpu.memory_space<vmem>>, %arg3: memref<1x256xf32, #tpu.memory_space<vmem>>, %arg4: memref<5x256x256xbf16, #tpu.memory_space<vmem>>, %arg5: memref<1x128xf32, #tpu.memory_space<vmem>>, %arg6: memref<4x128x128xbf16, #tpu.memory_space<vmem>>, %arg7: memref<1x128xf32, #tpu.memory_space<vmem>>, %arg8: memref<128x128xbf16, #tpu.memory_space<vmem>>, %arg9: memref<1x128xf32, #tpu.memory_space<vmem>>, %arg10: memref<128x128xbf16, #tpu.memory_space<vmem>>, %arg11: memref<1x128xf32, #tpu.memory_space<vmem>>, %arg12: memref<1x1x128xf32, #tpu.memory_space<vmem>>) attributes {dimension_semantics = [#tpu.dimension_semantics<parallel>], iteration_bounds = array<i64: 2>, scalar_prefetch = 0 : i64, scratch_operands = 0 : i64, tpu.core_type = #tpu.core_type<tc>, window_params = [{transform_indices = @transform_0, window_bounds = array<i64: 1, 4, 7, 28>}, {pipeline_mode = #tpu.pipeline_mode<synchronous>, transform_indices = @transform_1, window_bounds = array<i64: 5, 28, 512>}, {pipeline_mode = #tpu.pipeline_mode<synchronous>, transform_indices = @transform_2, window_bounds = array<i64: 1, 256>}, {pipeline_mode = #tpu.pipeline_mode<synchronous>, transform_indices = @transform_3, window_bounds = array<i64: 5, 256, 256>}, {pipeline_mode = #tpu.pipeline_mode<synchronous>, transform_indices = @transform_4, window_bounds = array<i64: 1, 128>}, {pipeline_mode = #tpu.pipeline_mode<synchronous>, transform_indices = @transform_5, window_bounds = array<i64: 4, 128, 128>}, {pipeline_mode = #tpu.pipeline_mode<synchronous>, transform_indices = @transform_6, window_bounds = array<i64: 1, 128>}, {pipeline_mode = #tpu.pipeline_mode<synchronous>, transform_indices = @transform_7, window_bounds = array<i64: 128, 128>}, {pipeline_mode = #tpu.pipeline_mode<synchronous>, transform_indices = @transform_8, window_bounds = array<i64: 1, 128>}, {pipeline_mode = #tpu.pipeline_mode<synchronous>, transform_indices = @transform_9, window_bounds = array<i64: 128, 128>}, {pipeline_mode = #tpu.pipeline_mode<synchronous>, transform_indices = @transform_10, window_bounds = array<i64: 1, 128>}, {transform_indices = @transform_11, window_bounds = array<i64: 1, 1, 128>}]} {
    %c0 = arith.constant 0 : index
    %c0_0 = arith.constant 0 : index
    %c0_1 = arith.constant 0 : index
    %c0_2 = arith.constant 0 : index
    %0 = vector.load %arg1[%c0, %c0_0, %c0_1, %c0_2] : memref<1x4x7x28xbf16, #tpu.memory_space<vmem>>, vector<1x1x7x28xbf16>
    %1 = vector.shape_cast %0 : vector<1x1x7x28xbf16> to vector<7x28xbf16>
    %c0_3 = arith.constant 0 : index
    %c1 = arith.constant 1 : index
    %c0_4 = arith.constant 0 : index
    %c0_5 = arith.constant 0 : index
    %2 = vector.load %arg1[%c0_3, %c1, %c0_4, %c0_5] : memref<1x4x7x28xbf16, #tpu.memory_space<vmem>>, vector<1x1x7x28xbf16>
    %3 = vector.shape_cast %2 : vector<1x1x7x28xbf16> to vector<7x28xbf16>
    %c0_6 = arith.constant 0 : index
    %c2 = arith.constant 2 : index
    %c0_7 = arith.constant 0 : index
    %c0_8 = arith.constant 0 : index
    %4 = vector.load %arg1[%c0_6, %c2, %c0_7, %c0_8] : memref<1x4x7x28xbf16, #tpu.memory_space<vmem>>, vector<1x1x7x28xbf16>
    %5 = vector.shape_cast %4 : vector<1x1x7x28xbf16> to vector<7x28xbf16>
    %c0_9 = arith.constant 0 : index
    %c3 = arith.constant 3 : index
    %c0_10 = arith.constant 0 : index
    %c0_11 = arith.constant 0 : index
    %6 = vector.load %arg1[%c0_9, %c3, %c0_10, %c0_11] : memref<1x4x7x28xbf16, #tpu.memory_space<vmem>>, vector<1x1x7x28xbf16>
    %7 = vector.shape_cast %6 : vector<1x1x7x28xbf16> to vector<7x28xbf16>
    %cst = arith.constant 0.000000e+00 : f32
    %8 = vector.broadcast %cst : f32 to vector<6x512xf32>
    %cst_12 = arith.constant 0.000000e+00 : f32
    %9 = vector.broadcast %cst_12 : f32 to vector<6x512xf32>
    %cst_13 = arith.constant 0.000000e+00 : f32
    %10 = vector.broadcast %cst_13 : f32 to vector<6x512xf32>
    %cst_14 = arith.constant 0.000000e+00 : f32
    %11 = vector.broadcast %cst_14 : f32 to vector<6x512xf32>
    %c0_15 = arith.constant 0 : index
    %c0_16 = arith.constant 0 : index
    %c0_17 = arith.constant 0 : index
    %12 = vector.load %arg2[%c0_15, %c0_16, %c0_17] : memref<5x28x512xbf16, #tpu.memory_space<vmem>>, vector<1x28x512xbf16>
    %13 = vector.shape_cast %12 : vector<1x28x512xbf16> to vector<28x512xbf16>
    %14 = vector.extract_strided_slice %1 {offsets = [0, 0], sizes = [6, 28], strides = [1, 1]} : vector<7x28xbf16> to vector<6x28xbf16>
    %cst_18 = arith.constant dense<0.000000e+00> : vector<6x512xf32>
    %15 = tpu.matmul %14, %13, %cst_18 {dimension_numbers = #tpu.dot_dimension_numbers<[1], [0], [0], [1], [0, 0, 1, 1], [], []>} : vector<6x28xbf16>, vector<28x512xbf16>, vector<6x512xf32> -> vector<6x512xf32>
    %16 = arith.addf %8, %15 : vector<6x512xf32>
    %17 = vector.extract_strided_slice %3 {offsets = [0, 0], sizes = [6, 28], strides = [1, 1]} : vector<7x28xbf16> to vector<6x28xbf16>
    %cst_19 = arith.constant dense<0.000000e+00> : vector<6x512xf32>
    %18 = tpu.matmul %17, %13, %cst_19 {dimension_numbers = #tpu.dot_dimension_numbers<[1], [0], [0], [1], [0, 0, 1, 1], [], []>} : vector<6x28xbf16>, vector<28x512xbf16>, vector<6x512xf32> -> vector<6x512xf32>
    %19 = arith.addf %9, %18 : vector<6x512xf32>
    %20 = vector.extract_strided_slice %5 {offsets = [0, 0], sizes = [6, 28], strides = [1, 1]} : vector<7x28xbf16> to vector<6x28xbf16>
    %cst_20 = arith.constant dense<0.000000e+00> : vector<6x512xf32>
    %21 = tpu.matmul %20, %13, %cst_20 {dimension_numbers = #tpu.dot_dimension_numbers<[1], [0], [0], [1], [0, 0, 1, 1], [], []>} : vector<6x28xbf16>, vector<28x512xbf16>, vector<6x512xf32> -> vector<6x512xf32>
    %22 = arith.addf %10, %21 : vector<6x512xf32>
    %23 = vector.extract_strided_slice %7 {offsets = [0, 0], sizes = [6, 28], strides = [1, 1]} : vector<7x28xbf16> to vector<6x28xbf16>
    %cst_21 = arith.constant dense<0.000000e+00> : vector<6x512xf32>
    %24 = tpu.matmul %23, %13, %cst_21 {dimension_numbers = #tpu.dot_dimension_numbers<[1], [0], [0], [1], [0, 0, 1, 1], [], []>} : vector<6x28xbf16>, vector<28x512xbf16>, vector<6x512xf32> -> vector<6x512xf32>
    %25 = arith.addf %11, %24 : vector<6x512xf32>
    %c1_22 = arith.constant 1 : index
    %c0_23 = arith.constant 0 : index
    %c0_24 = arith.constant 0 : index
    %26 = vector.load %arg2[%c1_22, %c0_23, %c0_24] : memref<5x28x512xbf16, #tpu.memory_space<vmem>>, vector<1x28x512xbf16>
    %27 = vector.shape_cast %26 : vector<1x28x512xbf16> to vector<28x512xbf16>
    %28 = vector.extract_strided_slice %3 {offsets = [0, 0], sizes = [6, 28], strides = [1, 1]} : vector<7x28xbf16> to vector<6x28xbf16>
    %cst_25 = arith.constant dense<0.000000e+00> : vector<6x512xf32>
    %29 = tpu.matmul %28, %27, %cst_25 {dimension_numbers = #tpu.dot_dimension_numbers<[1], [0], [0], [1], [0, 0, 1, 1], [], []>} : vector<6x28xbf16>, vector<28x512xbf16>, vector<6x512xf32> -> vector<6x512xf32>
    %30 = arith.addf %16, %29 : vector<6x512xf32>
    %31 = vector.extract_strided_slice %5 {offsets = [0, 0], sizes = [6, 28], strides = [1, 1]} : vector<7x28xbf16> to vector<6x28xbf16>
    %cst_26 = arith.constant dense<0.000000e+00> : vector<6x512xf32>
    %32 = tpu.matmul %31, %27, %cst_26 {dimension_numbers = #tpu.dot_dimension_numbers<[1], [0], [0], [1], [0, 0, 1, 1], [], []>} : vector<6x28xbf16>, vector<28x512xbf16>, vector<6x512xf32> -> vector<6x512xf32>
    %33 = arith.addf %19, %32 : vector<6x512xf32>
    %34 = vector.extract_strided_slice %7 {offsets = [0, 0], sizes = [6, 28], strides = [1, 1]} : vector<7x28xbf16> to vector<6x28xbf16>
    %cst_27 = arith.constant dense<0.000000e+00> : vector<6x512xf32>
    %35 = tpu.matmul %34, %27, %cst_27 {dimension_numbers = #tpu.dot_dimension_numbers<[1], [0], [0], [1], [0, 0, 1, 1], [], []>} : vector<6x28xbf16>, vector<28x512xbf16>, vector<6x512xf32> -> vector<6x512xf32>
    %36 = arith.addf %22, %35 : vector<6x512xf32>
    %37 = vector.extract_strided_slice %1 {offsets = [1, 0], sizes = [6, 28], strides = [1, 1]} : vector<7x28xbf16> to vector<6x28xbf16>
    %cst_28 = arith.constant dense<0.000000e+00> : vector<6x512xf32>
    %38 = tpu.matmul %37, %27, %cst_28 {dimension_numbers = #tpu.dot_dimension_numbers<[1], [0], [0], [1], [0, 0, 1, 1], [], []>} : vector<6x28xbf16>, vector<28x512xbf16>, vector<6x512xf32> -> vector<6x512xf32>
    %39 = arith.addf %25, %38 : vector<6x512xf32>
    %c2_29 = arith.constant 2 : index
    %c0_30 = arith.constant 0 : index
    %c0_31 = arith.constant 0 : index
    %40 = vector.load %arg2[%c2_29, %c0_30, %c0_31] : memref<5x28x512xbf16, #tpu.memory_space<vmem>>, vector<1x28x512xbf16>
    %41 = vector.shape_cast %40 : vector<1x28x512xbf16> to vector<28x512xbf16>
    %42 = vector.extract_strided_slice %5 {offsets = [0, 0], sizes = [6, 28], strides = [1, 1]} : vector<7x28xbf16> to vector<6x28xbf16>
    %cst_32 = arith.constant dense<0.000000e+00> : vector<6x512xf32>
    %43 = tpu.matmul %42, %41, %cst_32 {dimension_numbers = #tpu.dot_dimension_numbers<[1], [0], [0], [1], [0, 0, 1, 1], [], []>} : vector<6x28xbf16>, vector<28x512xbf16>, vector<6x512xf32> -> vector<6x512xf32>
    %44 = arith.addf %30, %43 : vector<6x512xf32>
    %45 = vector.extract_strided_slice %7 {offsets = [0, 0], sizes = [6, 28], strides = [1, 1]} : vector<7x28xbf16> to vector<6x28xbf16>
    %cst_33 = arith.constant dense<0.000000e+00> : vector<6x512xf32>
    %46 = tpu.matmul %45, %41, %cst_33 {dimension_numbers = #tpu.dot_dimension_numbers<[1], [0], [0], [1], [0, 0, 1, 1], [], []>} : vector<6x28xbf16>, vector<28x512xbf16>, vector<6x512xf32> -> vector<6x512xf32>
    %47 = arith.addf %33, %46 : vector<6x512xf32>
    %48 = vector.extract_strided_slice %1 {offsets = [1, 0], sizes = [6, 28], strides = [1, 1]} : vector<7x28xbf16> to vector<6x28xbf16>
    %cst_34 = arith.constant dense<0.000000e+00> : vector<6x512xf32>
    %49 = tpu.matmul %48, %41, %cst_34 {dimension_numbers = #tpu.dot_dimension_numbers<[1], [0], [0], [1], [0, 0, 1, 1], [], []>} : vector<6x28xbf16>, vector<28x512xbf16>, vector<6x512xf32> -> vector<6x512xf32>
    %50 = arith.addf %36, %49 : vector<6x512xf32>
    %51 = vector.extract_strided_slice %3 {offsets = [1, 0], sizes = [6, 28], strides = [1, 1]} : vector<7x28xbf16> to vector<6x28xbf16>
    %cst_35 = arith.constant dense<0.000000e+00> : vector<6x512xf32>
    %52 = tpu.matmul %51, %41, %cst_35 {dimension_numbers = #tpu.dot_dimension_numbers<[1], [0], [0], [1], [0, 0, 1, 1], [], []>} : vector<6x28xbf16>, vector<28x512xbf16>, vector<6x512xf32> -> vector<6x512xf32>
    %53 = arith.addf %39, %52 : vector<6x512xf32>
    %c3_36 = arith.constant 3 : index
    %c0_37 = arith.constant 0 : index
    %c0_38 = arith.constant 0 : index
    %54 = vector.load %arg2[%c3_36, %c0_37, %c0_38] : memref<5x28x512xbf16, #tpu.memory_space<vmem>>, vector<1x28x512xbf16>
    %55 = vector.shape_cast %54 : vector<1x28x512xbf16> to vector<28x512xbf16>
    %56 = vector.extract_strided_slice %7 {offsets = [0, 0], sizes = [6, 28], strides = [1, 1]} : vector<7x28xbf16> to vector<6x28xbf16>
    %cst_39 = arith.constant dense<0.000000e+00> : vector<6x512xf32>
    %57 = tpu.matmul %56, %55, %cst_39 {dimension_numbers = #tpu.dot_dimension_numbers<[1], [0], [0], [1], [0, 0, 1, 1], [], []>} : vector<6x28xbf16>, vector<28x512xbf16>, vector<6x512xf32> -> vector<6x512xf32>
    %58 = arith.addf %44, %57 : vector<6x512xf32>
    %59 = vector.extract_strided_slice %1 {offsets = [1, 0], sizes = [6, 28], strides = [1, 1]} : vector<7x28xbf16> to vector<6x28xbf16>
    %cst_40 = arith.constant dense<0.000000e+00> : vector<6x512xf32>
    %60 = tpu.matmul %59, %55, %cst_40 {dimension_numbers = #tpu.dot_dimension_numbers<[1], [0], [0], [1], [0, 0, 1, 1], [], []>} : vector<6x28xbf16>, vector<28x512xbf16>, vector<6x512xf32> -> vector<6x512xf32>
    %61 = arith.addf %47, %60 : vector<6x512xf32>
    %62 = vector.extract_strided_slice %3 {offsets = [1, 0], sizes = [6, 28], strides = [1, 1]} : vector<7x28xbf16> to vector<6x28xbf16>
    %cst_41 = arith.constant dense<0.000000e+00> : vector<6x512xf32>
    %63 = tpu.matmul %62, %55, %cst_41 {dimension_numbers = #tpu.dot_dimension_numbers<[1], [0], [0], [1], [0, 0, 1, 1], [], []>} : vector<6x28xbf16>, vector<28x512xbf16>, vector<6x512xf32> -> vector<6x512xf32>
    %64 = arith.addf %50, %63 : vector<6x512xf32>
    %65 = vector.extract_strided_slice %5 {offsets = [1, 0], sizes = [6, 28], strides = [1, 1]} : vector<7x28xbf16> to vector<6x28xbf16>
    %cst_42 = arith.constant dense<0.000000e+00> : vector<6x512xf32>
    %66 = tpu.matmul %65, %55, %cst_42 {dimension_numbers = #tpu.dot_dimension_numbers<[1], [0], [0], [1], [0, 0, 1, 1], [], []>} : vector<6x28xbf16>, vector<28x512xbf16>, vector<6x512xf32> -> vector<6x512xf32>
    %67 = arith.addf %53, %66 : vector<6x512xf32>
    %c4 = arith.constant 4 : index
    %c0_43 = arith.constant 0 : index
    %c0_44 = arith.constant 0 : index
    %68 = vector.load %arg2[%c4, %c0_43, %c0_44] : memref<5x28x512xbf16, #tpu.memory_space<vmem>>, vector<1x28x512xbf16>
    %69 = vector.shape_cast %68 : vector<1x28x512xbf16> to vector<28x512xbf16>
    %70 = vector.extract_strided_slice %1 {offsets = [1, 0], sizes = [6, 28], strides = [1, 1]} : vector<7x28xbf16> to vector<6x28xbf16>
    %cst_45 = arith.constant dense<0.000000e+00> : vector<6x512xf32>
    %71 = tpu.matmul %70, %69, %cst_45 {dimension_numbers = #tpu.dot_dimension_numbers<[1], [0], [0], [1], [0, 0, 1, 1], [], []>} : vector<6x28xbf16>, vector<28x512xbf16>, vector<6x512xf32> -> vector<6x512xf32>
    %72 = arith.addf %58, %71 : vector<6x512xf32>
    %73 = vector.extract_strided_slice %3 {offsets = [1, 0], sizes = [6, 28], strides = [1, 1]} : vector<7x28xbf16> to vector<6x28xbf16>
    %cst_46 = arith.constant dense<0.000000e+00> : vector<6x512xf32>
    %74 = tpu.matmul %73, %69, %cst_46 {dimension_numbers = #tpu.dot_dimension_numbers<[1], [0], [0], [1], [0, 0, 1, 1], [], []>} : vector<6x28xbf16>, vector<28x512xbf16>, vector<6x512xf32> -> vector<6x512xf32>
    %75 = arith.addf %61, %74 : vector<6x512xf32>
    %76 = vector.extract_strided_slice %5 {offsets = [1, 0], sizes = [6, 28], strides = [1, 1]} : vector<7x28xbf16> to vector<6x28xbf16>
    %cst_47 = arith.constant dense<0.000000e+00> : vector<6x512xf32>
    %77 = tpu.matmul %76, %69, %cst_47 {dimension_numbers = #tpu.dot_dimension_numbers<[1], [0], [0], [1], [0, 0, 1, 1], [], []>} : vector<6x28xbf16>, vector<28x512xbf16>, vector<6x512xf32> -> vector<6x512xf32>
    %78 = arith.addf %64, %77 : vector<6x512xf32>
    %79 = vector.extract_strided_slice %7 {offsets = [1, 0], sizes = [6, 28], strides = [1, 1]} : vector<7x28xbf16> to vector<6x28xbf16>
    %cst_48 = arith.constant dense<0.000000e+00> : vector<6x512xf32>
    %80 = tpu.matmul %79, %69, %cst_48 {dimension_numbers = #tpu.dot_dimension_numbers<[1], [0], [0], [1], [0, 0, 1, 1], [], []>} : vector<6x28xbf16>, vector<28x512xbf16>, vector<6x512xf32> -> vector<6x512xf32>
    %81 = arith.addf %67, %80 : vector<6x512xf32>
    %82 = arith.maximumf %72, %75 : vector<6x512xf32>
    %83 = vector.extract_strided_slice %82 {offsets = [0, 0], sizes = [6, 256], strides = [1, 1]} : vector<6x512xf32> to vector<6x256xf32>
    %84 = vector.extract_strided_slice %82 {offsets = [0, 256], sizes = [6, 256], strides = [1, 1]} : vector<6x512xf32> to vector<6x256xf32>
    %85 = arith.maximumf %83, %84 : vector<6x256xf32>
    %c0_49 = arith.constant 0 : index
    %c0_50 = arith.constant 0 : index
    %86 = vector.load %arg3[%c0_49, %c0_50] : memref<1x256xf32, #tpu.memory_space<vmem>>, vector<1x256xf32>
    %87 = vector.broadcast %86 : vector<1x256xf32> to vector<6x256xf32>
    %88 = arith.addf %85, %87 : vector<6x256xf32>
    %cst_51 = arith.constant 0.000000e+00 : f32
    %89 = vector.broadcast %cst_51 : f32 to vector<6x256xf32>
    %90 = arith.maximumf %88, %89 : vector<6x256xf32>
    %91 = arith.truncf %90 : vector<6x256xf32> to vector<6x256xbf16>
    %92 = arith.maximumf %78, %81 : vector<6x512xf32>
    %93 = vector.extract_strided_slice %92 {offsets = [0, 0], sizes = [6, 256], strides = [1, 1]} : vector<6x512xf32> to vector<6x256xf32>
    %94 = vector.extract_strided_slice %92 {offsets = [0, 256], sizes = [6, 256], strides = [1, 1]} : vector<6x512xf32> to vector<6x256xf32>
    %95 = arith.maximumf %93, %94 : vector<6x256xf32>
    %c0_52 = arith.constant 0 : index
    %c0_53 = arith.constant 0 : index
    %96 = vector.load %arg3[%c0_52, %c0_53] : memref<1x256xf32, #tpu.memory_space<vmem>>, vector<1x256xf32>
    %97 = vector.broadcast %96 : vector<1x256xf32> to vector<6x256xf32>
    %98 = arith.addf %95, %97 : vector<6x256xf32>
    %cst_54 = arith.constant 0.000000e+00 : f32
    %99 = vector.broadcast %cst_54 : f32 to vector<6x256xf32>
    %100 = arith.maximumf %98, %99 : vector<6x256xf32>
    %101 = arith.truncf %100 : vector<6x256xf32> to vector<6x256xbf16>
    %cst_55 = arith.constant 0.000000e+00 : f32
    %102 = vector.broadcast %cst_55 : f32 to vector<4x256xf32>
    %cst_56 = arith.constant 0.000000e+00 : f32
    %103 = vector.broadcast %cst_56 : f32 to vector<4x256xf32>
    %c0_57 = arith.constant 0 : index
    %c0_58 = arith.constant 0 : index
    %c0_59 = arith.constant 0 : index
    %104 = vector.load %arg4[%c0_57, %c0_58, %c0_59] : memref<5x256x256xbf16, #tpu.memory_space<vmem>>, vector<1x256x256xbf16>
    %105 = vector.shape_cast %104 : vector<1x256x256xbf16> to vector<256x256xbf16>
    %106 = vector.extract_strided_slice %91 {offsets = [0, 0], sizes = [4, 256], strides = [1, 1]} : vector<6x256xbf16> to vector<4x256xbf16>
    %cst_60 = arith.constant dense<0.000000e+00> : vector<4x256xf32>
    %107 = tpu.matmul %106, %105, %cst_60 {dimension_numbers = #tpu.dot_dimension_numbers<[1], [0], [0], [1], [0, 0, 1, 1], [], []>} : vector<4x256xbf16>, vector<256x256xbf16>, vector<4x256xf32> -> vector<4x256xf32>
    %108 = arith.addf %102, %107 : vector<4x256xf32>
    %109 = vector.extract_strided_slice %101 {offsets = [0, 0], sizes = [4, 256], strides = [1, 1]} : vector<6x256xbf16> to vector<4x256xbf16>
    %cst_61 = arith.constant dense<0.000000e+00> : vector<4x256xf32>
    %110 = tpu.matmul %109, %105, %cst_61 {dimension_numbers = #tpu.dot_dimension_numbers<[1], [0], [0], [1], [0, 0, 1, 1], [], []>} : vector<4x256xbf16>, vector<256x256xbf16>, vector<4x256xf32> -> vector<4x256xf32>
    %111 = arith.addf %103, %110 : vector<4x256xf32>
    %c1_62 = arith.constant 1 : index
    %c0_63 = arith.constant 0 : index
    %c0_64 = arith.constant 0 : index
    %112 = vector.load %arg4[%c1_62, %c0_63, %c0_64] : memref<5x256x256xbf16, #tpu.memory_space<vmem>>, vector<1x256x256xbf16>
    %113 = vector.shape_cast %112 : vector<1x256x256xbf16> to vector<256x256xbf16>
    %114 = vector.extract_strided_slice %101 {offsets = [0, 0], sizes = [4, 256], strides = [1, 1]} : vector<6x256xbf16> to vector<4x256xbf16>
    %cst_65 = arith.constant dense<0.000000e+00> : vector<4x256xf32>
    %115 = tpu.matmul %114, %113, %cst_65 {dimension_numbers = #tpu.dot_dimension_numbers<[1], [0], [0], [1], [0, 0, 1, 1], [], []>} : vector<4x256xbf16>, vector<256x256xbf16>, vector<4x256xf32> -> vector<4x256xf32>
    %116 = arith.addf %108, %115 : vector<4x256xf32>
    %117 = vector.extract_strided_slice %91 {offsets = [1, 0], sizes = [4, 256], strides = [1, 1]} : vector<6x256xbf16> to vector<4x256xbf16>
    %cst_66 = arith.constant dense<0.000000e+00> : vector<4x256xf32>
    %118 = tpu.matmul %117, %113, %cst_66 {dimension_numbers = #tpu.dot_dimension_numbers<[1], [0], [0], [1], [0, 0, 1, 1], [], []>} : vector<4x256xbf16>, vector<256x256xbf16>, vector<4x256xf32> -> vector<4x256xf32>
    %119 = arith.addf %111, %118 : vector<4x256xf32>
    %c2_67 = arith.constant 2 : index
    %c0_68 = arith.constant 0 : index
    %c0_69 = arith.constant 0 : index
    %120 = vector.load %arg4[%c2_67, %c0_68, %c0_69] : memref<5x256x256xbf16, #tpu.memory_space<vmem>>, vector<1x256x256xbf16>
    %121 = vector.shape_cast %120 : vector<1x256x256xbf16> to vector<256x256xbf16>
    %122 = vector.extract_strided_slice %91 {offsets = [1, 0], sizes = [4, 256], strides = [1, 1]} : vector<6x256xbf16> to vector<4x256xbf16>
    %cst_70 = arith.constant dense<0.000000e+00> : vector<4x256xf32>
    %123 = tpu.matmul %122, %121, %cst_70 {dimension_numbers = #tpu.dot_dimension_numbers<[1], [0], [0], [1], [0, 0, 1, 1], [], []>} : vector<4x256xbf16>, vector<256x256xbf16>, vector<4x256xf32> -> vector<4x256xf32>
    %124 = arith.addf %116, %123 : vector<4x256xf32>
    %125 = vector.extract_strided_slice %101 {offsets = [1, 0], sizes = [4, 256], strides = [1, 1]} : vector<6x256xbf16> to vector<4x256xbf16>
    %cst_71 = arith.constant dense<0.000000e+00> : vector<4x256xf32>
    %126 = tpu.matmul %125, %121, %cst_71 {dimension_numbers = #tpu.dot_dimension_numbers<[1], [0], [0], [1], [0, 0, 1, 1], [], []>} : vector<4x256xbf16>, vector<256x256xbf16>, vector<4x256xf32> -> vector<4x256xf32>
    %127 = arith.addf %119, %126 : vector<4x256xf32>
    %c3_72 = arith.constant 3 : index
    %c0_73 = arith.constant 0 : index
    %c0_74 = arith.constant 0 : index
    %128 = vector.load %arg4[%c3_72, %c0_73, %c0_74] : memref<5x256x256xbf16, #tpu.memory_space<vmem>>, vector<1x256x256xbf16>
    %129 = vector.shape_cast %128 : vector<1x256x256xbf16> to vector<256x256xbf16>
    %130 = vector.extract_strided_slice %101 {offsets = [1, 0], sizes = [4, 256], strides = [1, 1]} : vector<6x256xbf16> to vector<4x256xbf16>
    %cst_75 = arith.constant dense<0.000000e+00> : vector<4x256xf32>
    %131 = tpu.matmul %130, %129, %cst_75 {dimension_numbers = #tpu.dot_dimension_numbers<[1], [0], [0], [1], [0, 0, 1, 1], [], []>} : vector<4x256xbf16>, vector<256x256xbf16>, vector<4x256xf32> -> vector<4x256xf32>
    %132 = arith.addf %124, %131 : vector<4x256xf32>
    %133 = vector.extract_strided_slice %91 {offsets = [2, 0], sizes = [4, 256], strides = [1, 1]} : vector<6x256xbf16> to vector<4x256xbf16>
    %cst_76 = arith.constant dense<0.000000e+00> : vector<4x256xf32>
    %134 = tpu.matmul %133, %129, %cst_76 {dimension_numbers = #tpu.dot_dimension_numbers<[1], [0], [0], [1], [0, 0, 1, 1], [], []>} : vector<4x256xbf16>, vector<256x256xbf16>, vector<4x256xf32> -> vector<4x256xf32>
    %135 = arith.addf %127, %134 : vector<4x256xf32>
    %c4_77 = arith.constant 4 : index
    %c0_78 = arith.constant 0 : index
    %c0_79 = arith.constant 0 : index
    %136 = vector.load %arg4[%c4_77, %c0_78, %c0_79] : memref<5x256x256xbf16, #tpu.memory_space<vmem>>, vector<1x256x256xbf16>
    %137 = vector.shape_cast %136 : vector<1x256x256xbf16> to vector<256x256xbf16>
    %138 = vector.extract_strided_slice %91 {offsets = [2, 0], sizes = [4, 256], strides = [1, 1]} : vector<6x256xbf16> to vector<4x256xbf16>
    %cst_80 = arith.constant dense<0.000000e+00> : vector<4x256xf32>
    %139 = tpu.matmul %138, %137, %cst_80 {dimension_numbers = #tpu.dot_dimension_numbers<[1], [0], [0], [1], [0, 0, 1, 1], [], []>} : vector<4x256xbf16>, vector<256x256xbf16>, vector<4x256xf32> -> vector<4x256xf32>
    %140 = arith.addf %132, %139 : vector<4x256xf32>
    %141 = vector.extract_strided_slice %101 {offsets = [2, 0], sizes = [4, 256], strides = [1, 1]} : vector<6x256xbf16> to vector<4x256xbf16>
    %cst_81 = arith.constant dense<0.000000e+00> : vector<4x256xf32>
    %142 = tpu.matmul %141, %137, %cst_81 {dimension_numbers = #tpu.dot_dimension_numbers<[1], [0], [0], [1], [0, 0, 1, 1], [], []>} : vector<4x256xbf16>, vector<256x256xbf16>, vector<4x256xf32> -> vector<4x256xf32>
    %143 = arith.addf %135, %142 : vector<4x256xf32>
    %144 = arith.maximumf %140, %143 : vector<4x256xf32>
    %145 = vector.extract_strided_slice %144 {offsets = [0, 0], sizes = [4, 128], strides = [1, 1]} : vector<4x256xf32> to vector<4x128xf32>
    %146 = vector.extract_strided_slice %144 {offsets = [0, 128], sizes = [4, 128], strides = [1, 1]} : vector<4x256xf32> to vector<4x128xf32>
    %147 = arith.maximumf %145, %146 : vector<4x128xf32>
    %c0_82 = arith.constant 0 : index
    %c0_83 = arith.constant 0 : index
    %148 = vector.load %arg5[%c0_82, %c0_83] : memref<1x128xf32, #tpu.memory_space<vmem>>, vector<1x128xf32>
    %149 = vector.broadcast %148 : vector<1x128xf32> to vector<4x128xf32>
    %150 = arith.addf %147, %149 : vector<4x128xf32>
    %cst_84 = arith.constant 0.000000e+00 : f32
    %151 = vector.broadcast %cst_84 : f32 to vector<4x128xf32>
    %152 = arith.maximumf %150, %151 : vector<4x128xf32>
    %153 = arith.truncf %152 : vector<4x128xf32> to vector<4x128xbf16>
    %c0_85 = arith.constant 0 : index
    %c0_86 = arith.constant 0 : index
    %154 = vector.load %arg7[%c0_85, %c0_86] : memref<1x128xf32, #tpu.memory_space<vmem>>, vector<1x128xf32>
    %155 = vector.extract_strided_slice %153 {offsets = [0, 0], sizes = [1, 128], strides = [1, 1]} : vector<4x128xbf16> to vector<1x128xbf16>
    %c0_87 = arith.constant 0 : index
    %c0_88 = arith.constant 0 : index
    %c0_89 = arith.constant 0 : index
    %156 = vector.load %arg6[%c0_87, %c0_88, %c0_89] : memref<4x128x128xbf16, #tpu.memory_space<vmem>>, vector<1x128x128xbf16>
    %157 = vector.shape_cast %156 : vector<1x128x128xbf16> to vector<128x128xbf16>
    %cst_90 = arith.constant dense<0.000000e+00> : vector<1x128xf32>
    %158 = tpu.matmul %155, %157, %cst_90 {dimension_numbers = #tpu.dot_dimension_numbers<[1], [0], [0], [1], [0, 0, 1, 1], [], []>} : vector<1x128xbf16>, vector<128x128xbf16>, vector<1x128xf32> -> vector<1x128xf32>
    %159 = arith.addf %154, %158 : vector<1x128xf32>
    %160 = vector.extract_strided_slice %153 {offsets = [1, 0], sizes = [1, 128], strides = [1, 1]} : vector<4x128xbf16> to vector<1x128xbf16>
    %c1_91 = arith.constant 1 : index
    %c0_92 = arith.constant 0 : index
    %c0_93 = arith.constant 0 : index
    %161 = vector.load %arg6[%c1_91, %c0_92, %c0_93] : memref<4x128x128xbf16, #tpu.memory_space<vmem>>, vector<1x128x128xbf16>
    %162 = vector.shape_cast %161 : vector<1x128x128xbf16> to vector<128x128xbf16>
    %cst_94 = arith.constant dense<0.000000e+00> : vector<1x128xf32>
    %163 = tpu.matmul %160, %162, %cst_94 {dimension_numbers = #tpu.dot_dimension_numbers<[1], [0], [0], [1], [0, 0, 1, 1], [], []>} : vector<1x128xbf16>, vector<128x128xbf16>, vector<1x128xf32> -> vector<1x128xf32>
    %164 = arith.addf %159, %163 : vector<1x128xf32>
    %165 = vector.extract_strided_slice %153 {offsets = [2, 0], sizes = [1, 128], strides = [1, 1]} : vector<4x128xbf16> to vector<1x128xbf16>
    %c2_95 = arith.constant 2 : index
    %c0_96 = arith.constant 0 : index
    %c0_97 = arith.constant 0 : index
    %166 = vector.load %arg6[%c2_95, %c0_96, %c0_97] : memref<4x128x128xbf16, #tpu.memory_space<vmem>>, vector<1x128x128xbf16>
    %167 = vector.shape_cast %166 : vector<1x128x128xbf16> to vector<128x128xbf16>
    %cst_98 = arith.constant dense<0.000000e+00> : vector<1x128xf32>
    %168 = tpu.matmul %165, %167, %cst_98 {dimension_numbers = #tpu.dot_dimension_numbers<[1], [0], [0], [1], [0, 0, 1, 1], [], []>} : vector<1x128xbf16>, vector<128x128xbf16>, vector<1x128xf32> -> vector<1x128xf32>
    %169 = arith.addf %164, %168 : vector<1x128xf32>
    %170 = vector.extract_strided_slice %153 {offsets = [3, 0], sizes = [1, 128], strides = [1, 1]} : vector<4x128xbf16> to vector<1x128xbf16>
    %c3_99 = arith.constant 3 : index
    %c0_100 = arith.constant 0 : index
    %c0_101 = arith.constant 0 : index
    %171 = vector.load %arg6[%c3_99, %c0_100, %c0_101] : memref<4x128x128xbf16, #tpu.memory_space<vmem>>, vector<1x128x128xbf16>
    %172 = vector.shape_cast %171 : vector<1x128x128xbf16> to vector<128x128xbf16>
    %cst_102 = arith.constant dense<0.000000e+00> : vector<1x128xf32>
    %173 = tpu.matmul %170, %172, %cst_102 {dimension_numbers = #tpu.dot_dimension_numbers<[1], [0], [0], [1], [0, 0, 1, 1], [], []>} : vector<1x128xbf16>, vector<128x128xbf16>, vector<1x128xf32> -> vector<1x128xf32>
    %174 = arith.addf %169, %173 : vector<1x128xf32>
    %cst_103 = arith.constant 0.000000e+00 : f32
    %175 = vector.broadcast %cst_103 : f32 to vector<1x128xf32>
    %176 = arith.maximumf %174, %175 : vector<1x128xf32>
    %177 = arith.truncf %176 : vector<1x128xf32> to vector<1x128xbf16>
    %c0_104 = arith.constant 0 : index
    %c0_105 = arith.constant 0 : index
    %178 = vector.load %arg8[%c0_104, %c0_105] : memref<128x128xbf16, #tpu.memory_space<vmem>>, vector<128x128xbf16>
    %cst_106 = arith.constant dense<0.000000e+00> : vector<1x128xf32>
    %179 = tpu.matmul %177, %178, %cst_106 {dimension_numbers = #tpu.dot_dimension_numbers<[1], [0], [0], [1], [0, 0, 1, 1], [], []>} : vector<1x128xbf16>, vector<128x128xbf16>, vector<1x128xf32> -> vector<1x128xf32>
    %c0_107 = arith.constant 0 : index
    %c0_108 = arith.constant 0 : index
    %180 = vector.load %arg9[%c0_107, %c0_108] : memref<1x128xf32, #tpu.memory_space<vmem>>, vector<1x128xf32>
    %181 = arith.addf %179, %180 : vector<1x128xf32>
    %cst_109 = arith.constant 0.000000e+00 : f32
    %182 = vector.broadcast %cst_109 : f32 to vector<1x128xf32>
    %183 = arith.maximumf %181, %182 : vector<1x128xf32>
    %184 = arith.truncf %183 : vector<1x128xf32> to vector<1x128xbf16>
    %c0_110 = arith.constant 0 : index
    %c0_111 = arith.constant 0 : index
    %185 = vector.load %arg10[%c0_110, %c0_111] : memref<128x128xbf16, #tpu.memory_space<vmem>>, vector<128x128xbf16>
    %cst_112 = arith.constant dense<0.000000e+00> : vector<1x128xf32>
    %186 = tpu.matmul %184, %185, %cst_112 {dimension_numbers = #tpu.dot_dimension_numbers<[1], [0], [0], [1], [0, 0, 1, 1], [], []>} : vector<1x128xbf16>, vector<128x128xbf16>, vector<1x128xf32> -> vector<1x128xf32>
    %c0_113 = arith.constant 0 : index
    %c0_114 = arith.constant 0 : index
    %187 = vector.load %arg11[%c0_113, %c0_114] : memref<1x128xf32, #tpu.memory_space<vmem>>, vector<1x128xf32>
    %188 = arith.addf %186, %187 : vector<1x128xf32>
    %c0_115 = arith.constant 0 : index
    %c0_116 = arith.constant 0 : index
    %c0_117 = arith.constant 0 : index
    %189 = vector.load %arg12[%c0_115, %c0_116, %c0_117] : memref<1x1x128xf32, #tpu.memory_space<vmem>>, vector<1x1x128xf32>
    %190 = vector.shape_cast %189 : vector<1x1x128xf32> to vector<1x128xf32>
    %191 = vector.shape_cast %188 : vector<1x128xf32> to vector<1x1x128xf32>
    tpu.vector_store %arg12[%c0_115, %c0_116, %c0_117], %191 {strides = array<i32>} : memref<1x1x128xf32, #tpu.memory_space<vmem>>, vector<1x1x128xf32>,
    return
  }
  func.func @transform_0(%arg0: i32) -> (i32, i32, i32, i32) {
    %c0_i32 = arith.constant 0 : i32
    %c0_i32_0 = arith.constant 0 : i32
    %c0_i32_1 = arith.constant 0 : i32
    %c0_i32_2 = arith.constant 0 : i32
    return %arg0, %c0_i32, %c0_i32_0, %c0_i32_1 : i32, i32, i32, i32
  }
  func.func @transform_1(%arg0: i32) -> (i32, i32, i32) {
    %c0_i32 = arith.constant 0 : i32
    %c0_i32_0 = arith.constant 0 : i32
    %c0_i32_1 = arith.constant 0 : i32
    %c0_i32_2 = arith.constant 0 : i32
    return %c0_i32, %c0_i32_0, %c0_i32_1 : i32, i32, i32
  }
  func.func @transform_2(%arg0: i32) -> (i32, i32) {
    %c0_i32 = arith.constant 0 : i32
    %c0_i32_0 = arith.constant 0 : i32
    %c0_i32_1 = arith.constant 0 : i32
    return %c0_i32, %c0_i32_0 : i32, i32
  }
  func.func @transform_3(%arg0: i32) -> (i32, i32, i32) {
    %c0_i32 = arith.constant 0 : i32
    %c0_i32_0 = arith.constant 0 : i32
    %c0_i32_1 = arith.constant 0 : i32
    %c0_i32_2 = arith.constant 0 : i32
    return %c0_i32, %c0_i32_0, %c0_i32_1 : i32, i32, i32
  }
  func.func @transform_4(%arg0: i32) -> (i32, i32) {
    %c0_i32 = arith.constant 0 : i32
    %c0_i32_0 = arith.constant 0 : i32
    %c0_i32_1 = arith.constant 0 : i32
    return %c0_i32, %c0_i32_0 : i32, i32
  }
  func.func @transform_5(%arg0: i32) -> (i32, i32, i32) {
    %c0_i32 = arith.constant 0 : i32
    %c0_i32_0 = arith.constant 0 : i32
    %c0_i32_1 = arith.constant 0 : i32
    %c0_i32_2 = arith.constant 0 : i32
    return %c0_i32, %c0_i32_0, %c0_i32_1 : i32, i32, i32
  }
  func.func @transform_6(%arg0: i32) -> (i32, i32) {
    %c0_i32 = arith.constant 0 : i32
    %c0_i32_0 = arith.constant 0 : i32
    %c0_i32_1 = arith.constant 0 : i32
    return %c0_i32, %c0_i32_0 : i32, i32
  }
  func.func @transform_7(%arg0: i32) -> (i32, i32) {
    %c0_i32 = arith.constant 0 : i32
    %c0_i32_0 = arith.constant 0 : i32
    %c0_i32_1 = arith.constant 0 : i32
    return %c0_i32, %c0_i32_0 : i32, i32
  }
  func.func @transform_8(%arg0: i32) -> (i32, i32) {
    %c0_i32 = arith.constant 0 : i32
    %c0_i32_0 = arith.constant 0 : i32
    %c0_i32_1 = arith.constant 0 : i32
    return %c0_i32, %c0_i32_0 : i32, i32
  }
  func.func @transform_9(%arg0: i32) -> (i32, i32) {
    %c0_i32 = arith.constant 0 : i32
    %c0_i32_0 = arith.constant 0 : i32
    %c0_i32_1 = arith.constant 0 : i32
    return %c0_i32, %c0_i32_0 : i32, i32
  }
  func.func @transform_10(%arg0: i32) -> (i32, i32) {
    %c0_i32 = arith.constant 0 : i32
    %c0_i32_0 = arith.constant 0 : i32
    %c0_i32_1 = arith.constant 0 : i32
    return %c0_i32, %c0_i32_0 : i32, i32
  }
  func.func @transform_11(%arg0: i32) -> (i32, i32, i32) {
    %c0_i32 = arith.constant 0 : i32
    %c0_i32_0 = arith.constant 0 : i32
    %c0_i32_1 = arith.constant 0 : i32
    return %arg0, %c0_i32, %c0_i32_0 : i32, i32, i32
  }
}

</mosaic_0001>

<bundles_post_ra>
// kernel: custom_net_forward.1
= control target key start
LH: loop header
LB: loop body
LE: loop exit
PB: predicated region body
PF: predicated region fallthrough
CT: control target
= control target key end

     0   :  { %s6899_s0 = inlined_call_operand.vmem [shape: bf16[2,4,7,28], index: 0, kind: input, shape index: {}]   ;;  %s6900_s1 = inlined_call_operand.hbm [shape: bf16[5,28,512], index: 1, kind: input, shape index: {}]   ;;  %s6901_s2 = inlined_call_operand.vmem [shape: f32[1,256], index: 2, kind: input, shape index: {}]   ;;  %s6902_s3 = inlined_call_operand.hbm [shape: bf16[5,256,256], index: 3, kind: input, shape index: {}]   ;;  %s6903_s4 = inlined_call_operand.vmem [shape: f32[1,128], index: 4, kind: input, shape index: {}]   ;;  %s6904_s5 = inlined_call_operand.vmem [shape: bf16[4,128,128], index: 5, kind: input, shape index: {}]   ;;  %s6905_s6 = inlined_call_operand.vmem [shape: f32[1,128], index: 6, kind: input, shape index: {}]   ;;  %s6906_s7 = inlined_call_operand.hbm [shape: bf16[128,128], index: 7, kind: input, shape index: {}]   ;;  %s6907_s8 = inlined_call_operand.vmem [shape: f32[1,128], index: 8, kind: input, shape index: {}]   ;;  %s6908_s9 = inlined_call_operand.hbm [shape: bf16[128,128], index: 9, kind: input, shape index: {}]   ;;  %s6909_s10 = inlined_call_operand.vmem [shape: f32[1,128], index: 10, kind: input, shape index: {}]   ;;  %s6910_s11 = inlined_call_operand.hbm [shape: f32[2,1,128], index: 11, kind: output, shape index: {}]  }
   0x1   :  { %6920 = sst [smem:[#allocation21_spill]] %s6902_s3 }
   0x2   :  { %16 = vsyncpa [#allocation3], 0 }
   0x3   :  { %17 = vsyncpa [#allocation6], 0 }
   0x4   :  { %18 = vsyncpa [#allocation9], 0 }
   0x5   :  { %19 = vsyncpa [#allocation4], 0 }
   0x6   :  { %21 = vsyncpa [#allocation4 + $0x1], 0  ;;  %s6174_s17 = smov 0   ;;  %s6176_s18 = smov 0  }
   0x7   :  { %s6178_s19 = smov 0   ;;  %s6180_s20 = smov 0  }
   0x8 LB: > { %6921 = sst [smem:[#allocation15_spill]] %s6086_s17  ;;  %s6195_s21 = sadd.s32 4294967295, %s6098_s20   ;;  %s6098_s20 = sphi %s6180_s20, %s6945_s20   ;;  %s6094_s19 = sphi %s6178_s19, %s6947_s19   ;;  %s6090_s18 = sphi %s6176_s18, %s6949_s18   ;;  %s6086_s17 = sphi %s6174_s17, %s6948_s17  }
   0x9   : > { %6922 = sst [smem:[#allocation16_spill]] %s6094_s19  ;;  %s4725_s22 = sadd.s32 4294967294, %s6098_s20  }
   0xa   : > { %6923 = sst [smem:[#allocation17_spill]] %s6098_s20  ;;  %s6199_s23 = sadd.s32 1, %s6098_s20  }
   0xb   : > { %6924 = sst [smem:[#allocation18_spill]] %s6199_s23  ;;  %s270_s24 = sadd.s32 1, %s6094_s19 }
   0xc   : > { %s267_s25 = ssub.s32 %s6098_s20, %s6199_s23  ;;  %p280_p0 = scmp.ne.s32.totalorder %s6094_s19, %s6090_s18 }
   0xd   : > { %p268_p1 = scmp.eq.s32.totalorder %s267_s25, 0  ;;  %p281_p2 = scmp.eq.s32.totalorder %s6195_s21, 1 }
   0xe   : > { %p286_p3 = scmp.ne.s32.totalorder %s6090_s18, %s6086_s17  ;;  %p287_p4 = scmp.eq.s32.totalorder %s4725_s22, 1 }
   0xf   : > { %s6210_s26 = scalar_select %p268_p1, %s6094_s19, %s270_s24  }
  0x10   : > { %p6212_p5 = por %p281_p2, %p280_p0  ;;  %p6216_p6 = por %p287_p4, %p286_p3 }
  0x11   : > { %6925 = sst [smem:[#allocation19_spill]] %s6210_s26  ;;  %p4726_p7 = scmp.ge.s32.totalorder %s6098_s20, 1 }
  0x12   : > { %s6926_s27 = scalar_select %p6212_p5, 1, 0 }
  0x13   : > { %s6927_s28 = scalar_select %p6216_p6, 1, 0 }
  0x14   : > { %p294_p8 = scmp.lt.s32.totalorder %s6098_s20, 3  ;;  %p6912_p9 = scmp.eq.s32.totalorder %s6195_s21, 0 }
  0x15   : > { %6928 = sst [smem:[#allocation20_spill]] %s6927_s28  ;;  %s6100_s30 = smov [#allocation5]  }
  0x16   : > { %p6223_p10 = pnand %p4726_p7, %p294_p8  ;;  %s322_s12 = sshll.u32 %s6100_s30, 4  ;;  %s323_s12 = int_to_ptr.vmem [resolvable:$true] %s322_s12 }
  0x17   : > { %s6101_s14 = smov [#allocation2]   ;;  %s6931_s3 = sld [smem:[#allocation21_spill]] }
  0x18   : > { %s6929_s29 = scalar_select %p6223_p10, 1, 0 }
  0x19   : > { %p5489_p11 = pneg %p6223_p10  ;;  %s306_s15 = sshll.u32 %s6101_s14, 4  ;;  %s6235_s15 = int_to_ptr.vmem [resolvable:$true] %s306_s15 }
  0x1b   : > { %p6231_p12 = pnand %p6912_p9, %p5489_p11 }
  0x1d   : > { %s5912_s24 = scalar_lea.hbm %s6931_s3, 20480  ;;  %p6245_p0 = pneg %p6231_p12 }
  0x1e   : > { %p5913_p13 = scmp.ne.s32.totalorder %s6931_s3, %s5912_s24  ;;  %p5919_p3 = scmp.lt.u32.totalorder %s5912_s24, %s6931_s3 }
  0x20   : > { %p5915_p1 = pnand %p6245_p0, %p5913_p13 }
  0x22   : > { %p5916_p2 = pneg %p5915_p1 }
  0x24   : > { %p5921_p4 = pnand %p5919_p3, %p5916_p2 }
  0x26   : > { %5924 = shalt.err (!%p5921_p4)
}
  0x27   : > { %s5925_s16 = scalar_lea.vmem %s323_s12, 20480  ;;  %p5933_p9 = scmp.lt.s32.totalorder %s323_s12, %s323_s12 }
  0x28   : > { %p5926_p7 = scmp.ne.s32.totalorder %s323_s12, %s5925_s16  ;;  %p5934_p6 = scmp.lt.s32.totalorder %s5925_s16, %s5925_s16 }
  0x2a   : > { %p5928_p8 = pnand %p5926_p7, %p6245_p0  ;;  %p5935_p5 = por %p5934_p6, %p5933_p9 }
  0x2c   : > { %p5929_p11 = pneg %p5928_p8 }
  0x2e   : > { %p5936_p10 = pnand %p5935_p5, %p5929_p11 }
  0x30   : > { %5939 = shalt.err (!%p5936_p10)
}
  0x31   : > { %s6102_s26 = smov 128   ;;  %s6103_s22 = smov 8  }
  0x32   : > { %5495 = dma.hbm_to_vmem [thread:$0]  (!%p6231_p12), %s6931_s3, 20480, %s323_s12, [#allocation6], %s6102_s26, %s6102_s26, %s6103_s22  }
  0x33   : > { %s5940_s23 = scalar_lea.hbm %s6900_s1, 5120 }
  0x34   : > { %p5941_p13 = scmp.ne.s32.totalorder %s6900_s1, %s5940_s23  ;;  %p5947_p9 = scmp.lt.u32.totalorder %s5940_s23, %s6900_s1 }
  0x36   : > { %p5943_p5 = pnand %p5941_p13, %p6245_p0 }
  0x38   : > { %p5944_p6 = pneg %p5943_p5 }
  0x3a   : > { %p5949_p10 = pnand %p5947_p9, %p5944_p6 }
  0x3c   : > { %5952 = shalt.err (!%p5949_p10)
}
  0x3d   : > { %s5953_s12 = scalar_lea.vmem %s6235_s15, 5120  ;;  %p5961_p4 = scmp.lt.s32.totalorder %s6235_s15, %s6235_s15 }
  0x3e   : > { %p5954_p1 = scmp.ne.s32.totalorder %s6235_s15, %s5953_s12  ;;  %p5962_p7 = scmp.lt.s32.totalorder %s5953_s12, %s5953_s12 }
  0x40   : > { %p5956_p2 = pnand %p5954_p1, %p6245_p0  ;;  %p5963_p8 = por %p5962_p7, %p5961_p4 }
  0x42   : > { %p5957_p3 = pneg %p5956_p2 }
  0x44   : > { %p5964_p11 = pnand %p5963_p8, %p5957_p3 }
  0x46   : > { %5967 = shalt.err (!%p5964_p11)
}
  0x47   : > { %s6104_s17 = smov 256   ;;  %s6105_s20 = smov 16  }
  0x48   : > { %5492 = dma.hbm_to_vmem [thread:$0]  (!%p6231_p12), %s6900_s1, 5120, %s6235_s15, [#allocation3], %s6104_s17, %s6104_s17, %s6105_s20  }
  0x49   : > { %s6106_s26 = smov [#allocation7]   ;;  %s5968_s25 = scalar_lea.hbm %s6906_s7, 1024 }
  0x4a   : > { %s344_s22 = sshll.u32 %s6106_s26, 4  ;;  %p5969_p13 = scmp.ne.s32.totalorder %s6906_s7, %s5968_s25  ;;  %s345_s22 = int_to_ptr.vmem [resolvable:$true] %s344_s22 }
  0x4b   : > { %p5975_p9 = scmp.lt.u32.totalorder %s5968_s25, %s6906_s7 }
  0x4c   : > { %p5971_p5 = pnand %p5969_p13, %p6245_p0 }
  0x4e   : > { %p5972_p6 = pneg %p5971_p5 }
  0x50   : > { %p5977_p10 = pnand %p5975_p9, %p5972_p6 }
  0x52   : > { %5980 = shalt.err (!%p5977_p10)
}
  0x53   : > { %s5981_s15 = scalar_lea.vmem %s345_s22, 1024  ;;  %p5989_p4 = scmp.lt.s32.totalorder %s345_s22, %s345_s22 }
  0x54   : > { %p5982_p1 = scmp.ne.s32.totalorder %s345_s22, %s5981_s15  ;;  %p5990_p7 = scmp.lt.s32.totalorder %s5981_s15, %s5981_s15 }
  0x56   : > { %p5984_p2 = pnand %p5982_p1, %p6245_p0  ;;  %p5991_p8 = por %p5990_p7, %p5989_p4 }
  0x58   : > { %p5985_p3 = pneg %p5984_p2 }
  0x5a   : > { %p5992_p11 = pnand %p5991_p8, %p5985_p3 }
  0x5c   : > { %5995 = shalt.err (!%p5992_p11)
}
  0x5d   : > { %s6107_s17 = smov 64   ;;  %s6108_s20 = smov 4  }
  0x5e   : > { %5498 = dma.hbm_to_vmem [thread:$0]  (!%p6231_p12), %s6906_s7, 1024, %s345_s22, [#allocation6], %s6107_s17, %s6107_s17, %s6108_s20  }
  0x5f   : > { %s6109_s28 = smov [#allocation8]   ;;  %s5996_s25 = scalar_lea.hbm %s6908_s9, 1024 }
  0x60   : > { %s360_s26 = sshll.u32 %s6109_s28, 4  ;;  %p5997_p13 = scmp.ne.s32.totalorder %s6908_s9, %s5996_s25  ;;  %s361_s26 = int_to_ptr.vmem [resolvable:$true] %s360_s26 }
  0x61   : > { %p6003_p9 = scmp.lt.u32.totalorder %s5996_s25, %s6908_s9 }
  0x62   : > { %p5999_p5 = pnand %p5997_p13, %p6245_p0 }
  0x64   : > { %p6000_p6 = pneg %p5999_p5 }
  0x66   : > { %p6005_p10 = pnand %p6003_p9, %p6000_p6 }
  0x68   : > { %6008 = shalt.err (!%p6005_p10)
}
  0x69   : > { %s6009_s22 = scalar_lea.vmem %s361_s26, 1024  ;;  %p6017_p4 = scmp.lt.s32.totalorder %s361_s26, %s361_s26 }
  0x6a   : > { %p6010_p1 = scmp.ne.s32.totalorder %s361_s26, %s6009_s22  ;;  %p6018_p7 = scmp.lt.s32.totalorder %s6009_s22, %s6009_s22 }
  0x6c   : > { %p6012_p2 = pnand %p6010_p1, %p6245_p0  ;;  %p6019_p8 = por %p6018_p7, %p6017_p4 }
  0x6e   : > { %p6013_p3 = pneg %p6012_p2 }
  0x70   : > { %p6020_p11 = pnand %p6019_p8, %p6013_p3 }
  0x72   : > { %6023 = shalt.err (!%p6020_p11)
}
  0x73   : > { %5501 = dma.hbm_to_vmem [thread:$0]  (!%p6231_p12), %s6908_s9, 1024, %s361_s26, [#allocation9], %s6107_s17, %s6107_s17, %s6108_s20  }
  0x74   : > { %p6933_p13 = scmp.ne.s32.totalorder %s6929_s29, 0 }
  0x75   : > { %p6934_p5 = scmp.eq.s32.totalorder (!%p6933_p13), %s6195_s21, 0 }
  0x76   : > { %387 = sbr.rel (%p6933_p13) target bundleno = 1744 (0x6d0), region = 64 }
  0x7d   : > { %6069 = dma.done.wait (%p6934_p5), [#allocation3], 5120   ;;  %p6935_p0 = pmov %p6934_p5 }
  0x7f   : > { %6071 = vsyncadd (%p6935_p0), [#allocation3], 4294962176  ;;  %p6936_p6 = pmov %p6935_p0 }
  0x80   : > { %p6937_p9 = pmov %p6935_p0 }
  0x81   : > { %6073 = dma.done.wait (%p6936_p6), [#allocation6], 21504  }
  0x82   : > { %6075 = vsyncadd (%p6937_p9), [#allocation6], 4294945792  ;;  %p6938_p10 = pmov %p6935_p0 }
  0x83   : > { %p6939_p12 = pmov %p6935_p0 }
  0x84   : > { %6077 = dma.done.wait (%p6938_p10), [#allocation9], 1024  }
  0x85   : > { %6079 = vsyncadd (%p6939_p12), [#allocation9], 4294966272  ;;  %p438_p1 = scmp.lt.s32.totalorder %s6195_s21, 1  ;;  %v6110_v0 = vmov 0   ;;  %v6338_v1 = vld [vmem:[#allocation2 + $0x44] ss:$16 sps:$4 sm:$0xff]  }
  0x86   : > { %553 = vmatprep.mubr.bf16.mxu0 %v6110_v0  ;;  %594 = vmatprep.mubr.bf16.mxu1 %v6110_v0  ;;  %v6340_v2 = vld [vmem:[#allocation2 + $0x4c] ss:$16 sps:$4 sm:$0xff]   ;;  %v6343_v3 = vld [vmem:[#allocation2 + $0x40] ss:$16 sps:$4 sm:$0xff]   ;;  %v6345_v4 = vld [vmem:[#allocation2 + $0x48] ss:$16 sps:$4 sm:$0xff]  }
  0x87   : > { %s439_s29 = scalar_select %p438_p1, %s6195_s21, 1  ;;  %521 = vmatprep.subr.bf16.mxu0 %v6338_v1  ;;  %vm508_vm0 = vcmask 1045504   ;;  %562 = vmatprep.subr.bf16.mxu1 %v6340_v2  ;;  %v6348_v5 = vld [vmem:[#allocation2 + $0x64] ss:$16 sps:$4 sm:$0x3f]   ;;  %vm504_vm1 = vcmask 228352  }
  0x88   : > { %522 = vmatpush1.bf16.msra.mxu0 %v6343_v3  ;;  %563 = vmatpush1.bf16.msra.mxu1 %v6345_v4  ;;  %v6357_v6 = vld [vmem:[#allocation2 + $0x6c] ss:$16 sps:$4 sm:$0x3f]   ;;  %v5570_v7 = vld [vmem:[#allocation2 + $0x60] ss:$16 sps:$4 sm:$0x3f]  }
  0x89   : > { %s5126_s13 = sshll.u32 %s439_s29, 4  ;;  %4750 = vmatprep.subr.msk.bf16.mxu0 %vm508_vm0, %v6348_v5  ;;  %v5571_v8 = vld [vmem:[#allocation2 + $0x68] ss:$16 sps:$4 sm:$0x3f]   ;;  %4752 = vmatprep.subr.msk.bf16.mxu1 %vm508_vm0, %v6357_v6  ;;  %v6367_v10 = vsel %vm508_vm0, %v5570_v7, 0  ;;  %vm6112_vm2 = vmmov 0  }
  0x8a   : > { %s6353_s20 = scalar_lea.vmem %s6899_s0, %s5126_s13  ;;  %v6370_v11 = vsel %vm508_vm0, %v5571_v8, 0  ;;  %v6372_v12 = vld [vmem:[#allocation2 + $0x4] ss:$16 sps:$4 sm:$0xff]   ;;  %v6376_v13 = vld [vmem:[#allocation2 + $0xc] ss:$16 sps:$4 sm:$0xff]   ;;  %s436_s25 = sand.u32 1, %s6090_s18  }
  0x8b   : > { %v6364_v9 = vld [vmem:[%s6353_s20 + $0x4] sm:$0xf]  ;;  %v6378_v14 = vld [vmem:[#allocation2] ss:$16 sps:$4 sm:$0xff]   ;;  %v6380_v15 = vld [vmem:[#allocation2 + $0x8] ss:$16 sps:$4 sm:$0xff]  }
  0x8c   : > { %524 = vmatpush1.bf16.msra.mxu0 %v6367_v10  ;;  %565 = vmatpush1.bf16.msra.mxu1 %v6370_v11  ;;  %v6384_v16 = vld [vmem:[#allocation2 + $0x24] ss:$16 sps:$4 sm:$0x3f]   ;;  %v6390_v17 = vld [vmem:[#allocation2 + $0x2c] ss:$16 sps:$4 sm:$0x3f]   ;;  %v4811_v38 = vcombine.low %v6364_v9, %v6364_v9 }
  0x8d   : > { %654 = vmatprep.subr.bf16.mxu0 %v6372_v12  ;;  %695 = vmatprep.subr.bf16.mxu1 %v6376_v13  ;;  %v5583_v18 = vld [vmem:[#allocation2 + $0x20] ss:$16 sps:$4 sm:$0x3f]   ;;  %v5584_v19 = vld [vmem:[#allocation2 + $0x28] ss:$16 sps:$4 sm:$0x3f]  }
  0x8e   : > { %v6399_v20 = vsel %vm508_vm0, %v5583_v18, 0  ;;  %v6402_v21 = vsel %vm508_vm0, %v5584_v19, 0  ;;  %v444_v22 = vld [vmem:[%s6353_s20] sm:$0xf]  ;;  %v6424_v23 = vld [vmem:[%s6353_s20 + $0x8] sm:$0xf] }
  0x8f   : > { %4751 = vmatmul.mubr.msk.bf16.vlgmr.msra.gmra.mrb[0].mxu0 %vm504_vm1, %v6364_v9  ;;  %4753 = vmatmul.mubr.msk.bf16.vlgmr.msra.gmra.mrb[0].mxu1 %vm504_vm1, %v6364_v9  ;;  %v6455_v24 = vld [vmem:[%s6353_s20 + $0xc] sm:$0xf]  ;;  %v4782_v25 = vcombine.low %v444_v22, %v444_v22  ;;  %v5586_v30 = vld [vmem:[#allocation2 + $0x84] ss:$16 sps:$4 sm:$0xff]   ;;  %v5590_v32 = vld [vmem:[#allocation2 + $0x80] ss:$16 sps:$4 sm:$0xff]   ;;  %v4836_v55 = vcombine.low %v6424_v23, %v6424_v23 }
  0x90   : > { %655 = vmatpush1.bf16.msra.mxu0 %v6378_v14  ;;  %696 = vmatpush1.bf16.msra.mxu1 %v6380_v15  ;;  %v5588_v31 = vld [vmem:[#allocation2 + $0x8c] ss:$16 sps:$4 sm:$0xff]   ;;  %v5592_v33 = vld [vmem:[#allocation2 + $0xa4] ss:$16 sps:$4 sm:$0x3f]   ;;  %v1568_v41 = vshll.u32 %v4811_v38, 16  ;;  %v4861_v7 = vcombine.low %v6455_v24, %v6455_v24 }
  0x91   : > { %4762 = vmatprep.subr.msk.bf16.mxu0 %vm508_vm0, %v6384_v16  ;;  %4764 = vmatprep.subr.msk.bf16.mxu1 %vm508_vm0, %v6390_v17  ;;  %v1076_v26 = vshll.u32 %v4782_v25, 16  ;;  %v1074_v27 = vshrl.u32 %v4782_v25, 16  ;;  %v5594_v34 = vld [vmem:[#allocation2 + $0xac] ss:$16 sps:$4 sm:$0x3f]   ;;  %v1566_v44 = vshrl.u32 %v4811_v38, 16 }
  0x92   : > { %686 = vmatprep.mubr.bf16.mxu0 %v6110_v0  ;;  %727 = vmatprep.mubr.bf16.mxu1 %v6110_v0  ;;  %v5596_v35 = vld [vmem:[#allocation2 + $0xa0] ss:$16 sps:$4 sm:$0x3f]   ;;  %v5591_v36 = vld [vmem:[#allocation2 + $0x88] ss:$16 sps:$4 sm:$0xff]   ;;  %v1570_v45 = vrot.slane %v1568_v41, 1 }
  0x93   : > { %v1078_v28 = vrot.slane %v1076_v26, 1  ;;  %v5597_v37 = vld [vmem:[#allocation2 + $0xa8] ss:$16 sps:$4 sm:$0x3f]   ;;  %v1293_v42 = vsel %vm508_vm0, %v5596_v35, 0  ;;  %v1982_v56 = vshll.u32 %v4836_v55, 16 }
  0x94   : > { %657 = vmatpush1.bf16.msra.mxu0 %v6399_v20  ;;  %698 = vmatpush1.bf16.msra.mxu1 %v6402_v21  ;;  %v5608_v39 = vld [vmem:[#allocation2 + $0xe0] ss:$16 sps:$4 sm:$0x3f]   ;;  %v5609_v40 = vld [vmem:[#allocation2 + $0xe8] ss:$16 sps:$4 sm:$0x3f]   ;;  %v6553_v52 = vor.u32 %v1570_v45, %v1566_v44  ;;  %v2497_v44 = vlaneseq }
  0x95   : > { %739 = vmatprep.subr.bf16.mxu0 %v6338_v1  ;;  %780 = vmatprep.subr.bf16.mxu1 %v6340_v2  ;;  %v6491_v29 = vor.u32 %v1078_v28, %v1074_v27  ;;  %v1299_v43 = vsel %vm508_vm0, %v5597_v37, 0  ;;  %v6524_v46 = vsel %vm508_vm0, %v5608_v39, 0  ;;  %v6527_v47 = vsel %vm508_vm0, %v5609_v40, 0  ;;  %v5598_v48 = vld [vmem:[#allocation2 + $0xc4] ss:$16 sps:$4 sm:$0xff]   ;;  %s5123_s12 = sshll.u32 %s6195_s21, 4 }
  0x96   : > { %v5600_v49 = vld [vmem:[#allocation2 + $0xcc] ss:$16 sps:$4 sm:$0xff]   ;;  %v5602_v50 = vld [vmem:[#allocation2 + $0xc0] ss:$16 sps:$4 sm:$0xff]   ;;  %v5603_v51 = vld [vmem:[#allocation2 + $0xc8] ss:$16 sps:$4 sm:$0xff]   ;;  %s6857_s29 = scalar_lea.hbm %s6910_s11, %s5123_s12 }
  0x97   : > { %v5604_v53 = vld [vmem:[#allocation2 + $0xe4] ss:$16 sps:$4 sm:$0x3f]   ;;  %v5606_v54 = vld [vmem:[#allocation2 + $0xec] ss:$16 sps:$4 sm:$0x3f]  }
  0x98   : > { %v1980_v57 = vshrl.u32 %v4836_v55, 16  ;;  %v1984_v58 = vrot.slane %v1982_v56, 1  ;;  %v5611_v59 = vld [vmem:[#allocation2 + $0x104] ss:$16 sps:$4 sm:$0xff]   ;;  %v5613_v60 = vld [vmem:[#allocation2 + $0x10c] ss:$16 sps:$4 sm:$0xff]  }
  0x99   : > { %v5615_v62 = vld [vmem:[#allocation2 + $0x100] ss:$16 sps:$4 sm:$0xff]   ;;  %v5616_v63 = vld [vmem:[#allocation2 + $0x108] ss:$16 sps:$4 sm:$0xff]   ;;  %v2396_v8 = vshll.u32 %v4861_v7, 16  ;;  %s437_s15 = scalar_lea.vmem [#allocation10], %s436_s25 }
  0x9a   : > { %v1985_v61 = vor.u32 %v1984_v58, %v1980_v57  ;;  %v5633_v18 = vld [vmem:[#allocation5 + $0x130] ss:$8 sps:$4 sm:$0xff]   ;;  %v5638_v19 = vld [vmem:[#allocation5 + $0x144] ss:$8 sps:$4 sm:$0xff]   ;;  %v5647_v25 = vld [vmem:[#allocation5 + $0x174] ss:$8 sps:$4 sm:$0xff]  }
  0x9b   : > { %4763 = vmatmul.mubr.msk.bf16.vlgmr.msra.gmra.mrb[0].mxu0 %vm504_vm1, %v444_v22  ;;  %4765 = vmatmul.mubr.msk.bf16.vlgmr.msra.gmra.mrb[0].mxu1 %vm504_vm1, %v444_v22  ;;  %v5639_v22 = vld [vmem:[#allocation5 + $0x150] ss:$8 sps:$4 sm:$0xff]   ;;  %v5650_v27 = vld [vmem:[#allocation5 + $0x184] ss:$8 sps:$4 sm:$0xff]   ;;  %v5648_v28 = vld [vmem:[#allocation5 + $0x180] ss:$8 sps:$4 sm:$0xff]  }
  0x9c   : > { %740 = vmatpush1.bf16.msra.mxu0 %v6343_v3  ;;  %781 = vmatpush1.bf16.msra.mxu1 %v6345_v4  ;;  %v5645_v26 = vld [vmem:[#allocation5 + $0x170] ss:$8 sps:$4 sm:$0xff]   ;;  %v5662_v35 = vld [vmem:[#allocation5 + $0x1c4] ss:$8 sps:$4 sm:$0xff]   ;;  %v5665_v37 = vld [vmem:[#allocation5 + $0x1d4] ss:$8 sps:$4 sm:$0xff]  }
  0x9d   : > { %4766 = vmatprep.subr.msk.bf16.mxu0 %vm508_vm0, %v6348_v5  ;;  %4768 = vmatprep.subr.msk.bf16.mxu1 %vm508_vm0, %v6357_v6  ;;  %v5663_v38 = vld [vmem:[#allocation5 + $0x1d0] ss:$8 sps:$4 sm:$0xff]   ;;  %v5668_v39 = vld [vmem:[#allocation5 + $0x1e4] ss:$8 sps:$4 sm:$0xff]   ;;  %v5666_v40 = vld [vmem:[#allocation5 + $0x1e0] ss:$8 sps:$4 sm:$0xff]  }
  0x9e   : > { %771 = vmatprep.mubr.bf16.mxu0 %v6110_v0  ;;  %812 = vmatprep.mubr.bf16.mxu1 %v6110_v0  ;;  %v5669_v41 = vld [vmem:[#allocation5 + $0x1f0] ss:$8 sps:$4 sm:$0xff]   ;;  %v2495_v55 = vld [vmem:[%s6901_s2] sm:$0x3]  ;;  %s4629_s22 = sshll.u32 %s437_s15, 4  ;;  %s4617_s13 = scalar_lea.sflag [#allocation4], %s436_s25  ;;  %s6859_s22 = int_to_ptr.vmem [resolvable:$true] %s4629_s22 }
  0x9f   : > { %s6024_s21 = scalar_lea.vmem %s6859_s22, 16  ;;  %p6940_p3 = scmp.ne.s32.totalorder %s6926_s27, 0 }
  0xa0   : > { %742 = vmatpush1.bf16.msra.mxu0 %v6367_v10  ;;  %783 = vmatpush1.bf16.msra.mxu1 %v6370_v11  ;;  %p6025_p2 = scmp.ne.s32.totalorder %s6859_s22, %s6024_s21  ;;  %s6113_s30 = smov [#allocation10]  }
  0xa1   : > { %821 = vmatprep.subr.bf16.mxu0 %v6372_v12  ;;  %862 = vmatprep.subr.bf16.mxu1 %v6376_v13  ;;  %s6028_s17 = sshll.u32 %s6113_s30, 4  ;;  %s6029_s17 = int_to_ptr.vmem [resolvable:$false] %s6028_s17 }
  0xa2   : > { %p6026_p4 = pnand %p6025_p2, %p6940_p3  ;;  %s6030_s20 = scalar_lea.vmem %s6029_s17, 32 }
  0xa3   : > { %4767 = vmatmul.mubr.msk.bf16.vlgmr.msra.gmra.mrb[4].mxu0 %vm504_vm1, %v6424_v23  ;;  %4769 = vmatmul.mubr.msk.bf16.vlgmr.msra.gmra.mrb[4].mxu1 %vm504_vm1, %v6424_v23  ;;  %p6031_p8 = scmp.lt.s32.totalorder %s6859_s22, %s6029_s17  ;;  %p6032_p11 = scmp.lt.s32.totalorder %s6030_s20, %s6024_s21 }
  0xa4   : > { %822 = vmatpush1.bf16.msra.mxu0 %v6378_v14  ;;  %863 = vmatpush1.bf16.msra.mxu1 %v6380_v15  ;;  %p6027_p7 = pneg %p6026_p4 }
  0xa5   : > { %4770 = vmatprep.subr.msk.bf16.mxu0 %vm508_vm0, %v6384_v16  ;;  %4772 = vmatprep.subr.msk.bf16.mxu1 %vm508_vm0, %v6390_v17  ;;  %p6033_p13 = por %p6032_p11, %p6031_p8 }
  0xa6   : > { %853 = vmatprep.mubr.bf16.mxu0 %v6110_v0  ;;  %894 = vmatprep.mubr.bf16.mxu1 %v6110_v0 }
  0xa7   : > { %p6034_p5 = pnand %p6033_p13, %p6027_p7 }
  0xa8   : > { %824 = vmatpush1.bf16.msra.mxu0 %v6399_v20  ;;  %865 = vmatpush1.bf16.msra.mxu1 %v6402_v21 }
  0xa9   : > { %906 = vmatprep.subr.bf16.mxu0 %v6338_v1  ;;  %947 = vmatprep.subr.bf16.mxu1 %v6340_v2 }
  0xaf   : > { %4771 = vmatmul.mubr.msk.bf16.vlgmr.msra.gmra.mrb[4].mxu0 %vm504_vm1, %v6364_v9  ;;  %4773 = vmatmul.mubr.msk.bf16.vlgmr.msra.gmra.mrb[4].mxu1 %vm504_vm1, %v6364_v9  ;;  %v2394_v9 = vshrl.u32 %v4861_v7, 16 }
  0xb0   : > { %907 = vmatpush1.bf16.msra.mxu0 %v6343_v3  ;;  %948 = vmatpush1.bf16.msra.mxu1 %v6345_v4 }
  0xb1   : > { %4774 = vmatprep.subr.msk.bf16.mxu0 %vm508_vm0, %v6348_v5  ;;  %4776 = vmatprep.subr.msk.bf16.mxu1 %vm508_vm0, %v6357_v6 }
  0xb2   : > { %938 = vmatprep.mubr.bf16.mxu0 %v6110_v0  ;;  %979 = vmatprep.mubr.bf16.mxu1 %v6110_v0 }
  0xb4   : > { %909 = vmatpush1.bf16.msra.mxu0 %v6367_v10  ;;  %950 = vmatpush1.bf16.msra.mxu1 %v6370_v11 }
  0xb5   : > { %988 = vmatprep.subr.bf16.mxu0 %v6372_v12  ;;  %1029 = vmatprep.subr.bf16.mxu1 %v6376_v13 }
  0xb7   : > { %4775 = vmatmul.mubr.msk.bf16.vlgmr.msra.gmra.mrb[8].mxu0 %vm504_vm1, %v6455_v24  ;;  %4777 = vmatmul.mubr.msk.bf16.vlgmr.msra.gmra.mrb[8].mxu1 %vm504_vm1, %v6455_v24 }
  0xb8   : > { %989 = vmatpush1.bf16.msra.mxu0 %v6378_v14  ;;  %1030 = vmatpush1.bf16.msra.mxu1 %v6380_v15 }
  0xb9   : > { %4778 = vmatprep.subr.msk.bf16.mxu0 %vm508_vm0, %v6384_v16  ;;  %4780 = vmatprep.subr.msk.bf16.mxu1 %vm508_vm0, %v6390_v17 }
  0xba   : > { %1020 = vmatprep.mubr.bf16.mxu0 %v6110_v0  ;;  %1061 = vmatprep.mubr.bf16.mxu1 %v6110_v0 }
  0xbc   : > { %991 = vmatpush1.bf16.msra.mxu0 %v6399_v20  ;;  %1032 = vmatpush1.bf16.msra.mxu1 %v6402_v21 }
  0xbd   : > { %1083 = vmatprep.subr.bf16.mxu0 %v6338_v1  ;;  %1124 = vmatprep.subr.bf16.mxu1 %v6340_v2  ;;  %v5617_v1 = vld [vmem:[#allocation2 + $0x124] ss:$16 sps:$4 sm:$0x3f]   ;;  %v5619_v2 = vld [vmem:[#allocation2 + $0x12c] ss:$16 sps:$4 sm:$0x3f]  }
  0xc3   : > { %4779 = vmatmul.mubr.msk.bf16.vlgmr.msra.gmra.mrb[8].mxu0 %vm504_vm1, %v6424_v23  ;;  %4781 = vmatmul.mubr.msk.bf16.vlgmr.msra.gmra.mrb[8].mxu1 %vm504_vm1, %v6424_v23 }
  0xc4   : > { %1084 = vmatpush1.bf16.msra.mxu0 %v6343_v3  ;;  %1125 = vmatpush1.bf16.msra.mxu1 %v6345_v4  ;;  %v5621_v3 = vld [vmem:[#allocation2 + $0x120] ss:$16 sps:$4 sm:$0x3f]   ;;  %v5622_v4 = vld [vmem:[#allocation2 + $0x128] ss:$16 sps:$4 sm:$0x3f]  }
  0xc5   : > { %4783 = vmatprep.subr.msk.bf16.mxu0 %vm508_vm0, %v6348_v5  ;;  %4785 = vmatprep.subr.msk.bf16.mxu1 %vm508_vm0, %v6357_v6  ;;  %v2121_v5 = vsel %vm508_vm0, %v5621_v3, 0  ;;  %v2127_v6 = vsel %vm508_vm0, %v5622_v4, 0 }
  0xc6   : > { %1115 = vmatprep.mubr.bf16.mxu0 %v6110_v0  ;;  %1156 = vmatprep.mubr.bf16.mxu1 %v6110_v0 }
  0xc8   : > { %1086 = vmatpush1.bf16.msra.mxu0 %v6367_v10  ;;  %1127 = vmatpush1.bf16.msra.mxu1 %v6370_v11  ;;  %v2398_v10 = vrot.slane %v2396_v8, 1  ;;  %v5626_v11 = vld [vmem:[#allocation5 + $0x104] ss:$8 sps:$4 sm:$0xff]  }
  0xc9   : > { %1165 = vmatprep.subr.bf16.mxu0 %v6372_v12  ;;  %1206 = vmatprep.subr.bf16.mxu1 %v6376_v13  ;;  %v5624_v13 = vld [vmem:[#allocation5 + $0x100] ss:$8 sps:$4 sm:$0xff]  }
  0xca   : > { %v2399_v12 = vor.u32 %v2398_v10, %v2394_v9 }
  0xcb   : > { %4784 = vmatmul.mubr.msk.bf16.vlgmr.msra.gmra.mrb[12].mxu0 %vm504_vm1, %v6491_v29  ;;  %4786 = vmatmul.mubr.msk.bf16.vlgmr.msra.gmra.mrb[12].mxu1 %vm504_vm1, %v6491_v29 }
  0xcc   : > { %1166 = vmatpush1.bf16.msra.mxu0 %v6378_v14  ;;  %1207 = vmatpush1.bf16.msra.mxu1 %v6380_v15  ;;  %v5629_v14 = vld [vmem:[#allocation5 + $0x114] ss:$8 sps:$4 sm:$0xff]   ;;  %v5627_v15 = vld [vmem:[#allocation5 + $0x110] ss:$8 sps:$4 sm:$0xff]  }
  0xcd   : > { %4787 = vmatprep.subr.msk.bf16.mxu0 %vm508_vm0, %v6384_v16  ;;  %4789 = vmatprep.subr.msk.bf16.mxu1 %vm508_vm0, %v6390_v17  ;;  %v5632_v16 = vld [vmem:[#allocation5 + $0x124] ss:$8 sps:$4 sm:$0xff]   ;;  %v5630_v17 = vld [vmem:[#allocation5 + $0x120] ss:$8 sps:$4 sm:$0xff]  }
  0xce   : > { %1197 = vmatprep.mubr.bf16.mxu0 %v6110_v0  ;;  %1238 = vmatprep.mubr.bf16.mxu1 %v6110_v0 }
  0xd0   : > { %1168 = vmatpush1.bf16.msra.mxu0 %v6399_v20  ;;  %1209 = vmatpush1.bf16.msra.mxu1 %v6402_v21  ;;  %v5636_v20 = vld [vmem:[#allocation5 + $0x140] ss:$8 sps:$4 sm:$0xff]   ;;  %v5641_v21 = vld [vmem:[#allocation5 + $0x154] ss:$8 sps:$4 sm:$0xff]  }
  0xd1   : > { %1304 = vmatprep.subr.bf16.mxu0 %v5586_v30  ;;  %1345 = vmatprep.subr.bf16.mxu1 %v5588_v31 }
  0xd7   : > { %4788 = vmatmul.mubr.msk.bf16.vlgmr.msra.gmra.mrb[12].mxu0 %vm504_vm1, %v6455_v24  ;;  %4790 = vmatmul.mubr.msk.bf16.vlgmr.msra.gmra.mrb[12].mxu1 %vm504_vm1, %v6455_v24 }
  0xd8   : > { %1305 = vmatpush1.bf16.msra.mxu0 %v5590_v32  ;;  %1346 = vmatpush1.bf16.msra.mxu1 %v5591_v36 }
  0xd9   : > { %4799 = vmatprep.subr.msk.bf16.mxu0 %vm508_vm0, %v5592_v33  ;;  %4801 = vmatprep.subr.msk.bf16.mxu1 %vm508_vm0, %v5594_v34 }
  0xda   : > { %1336 = vmatprep.mubr.bf16.mxu0 %v6110_v0  ;;  %1377 = vmatprep.mubr.bf16.mxu1 %v6110_v0 }
  0xdc   : > { %1307 = vmatpush1.bf16.msra.mxu0 %v1293_v42  ;;  %1348 = vmatpush1.bf16.msra.mxu1 %v1299_v43 }
  0xdd   : > { %1390 = vmatprep.subr.bf16.mxu0 %v5586_v30  ;;  %1431 = vmatprep.subr.bf16.mxu1 %v5588_v31 }
  0xdf   : > { %4800 = vmatmul.mubr.msk.bf16.vlgmr.msra.gmra.mrb[0].mxu0 %vm504_vm1, %v6424_v23  ;;  %4802 = vmatmul.mubr.msk.bf16.vlgmr.msra.gmra.mrb[0].mxu1 %vm504_vm1, %v6424_v23  ;;  %v5644_v23 = vld [vmem:[#allocation5 + $0x164] ss:$8 sps:$4 sm:$0xff]  }
  0xe0   : > { %1391 = vmatpush1.bf16.msra.mxu0 %v5590_v32  ;;  %1432 = vmatpush1.bf16.msra.mxu1 %v5591_v36 }
  0xe1   : > { %4803 = vmatprep.subr.msk.bf16.mxu0 %vm508_vm0, %v5592_v33  ;;  %4805 = vmatprep.subr.msk.bf16.mxu1 %vm508_vm0, %v5594_v34 }
  0xe2   : > { %1422 = vmatprep.mubr.bf16.mxu0 %v6110_v0  ;;  %1463 = vmatprep.mubr.bf16.mxu1 %v6110_v0 }
  0xe4   : > { %1393 = vmatpush1.bf16.msra.mxu0 %v1293_v42  ;;  %1434 = vmatpush1.bf16.msra.mxu1 %v1299_v43 }
  0xe5   : > { %1476 = vmatprep.subr.bf16.mxu0 %v5586_v30  ;;  %1517 = vmatprep.subr.bf16.mxu1 %v5588_v31 }
  0xe7   : > { %4804 = vmatmul.mubr.msk.bf16.vlgmr.msra.gmra.mrb[4].mxu0 %vm504_vm1, %v6455_v24  ;;  %4806 = vmatmul.mubr.msk.bf16.vlgmr.msra.gmra.mrb[4].mxu1 %vm504_vm1, %v6455_v24 }
  0xe8   : > { %1477 = vmatpush1.bf16.msra.mxu0 %v5590_v32  ;;  %1518 = vmatpush1.bf16.msra.mxu1 %v5591_v36 }
  0xe9   : > { %4807 = vmatprep.subr.msk.bf16.mxu0 %vm508_vm0, %v5592_v33  ;;  %4809 = vmatprep.subr.msk.bf16.mxu1 %vm508_vm0, %v5594_v34 }
  0xea   : > { %1508 = vmatprep.mubr.bf16.mxu0 %v6110_v0  ;;  %1549 = vmatprep.mubr.bf16.mxu1 %v6110_v0 }
  0xec   : > { %1479 = vmatpush1.bf16.msra.mxu0 %v1293_v42  ;;  %1520 = vmatpush1.bf16.msra.mxu1 %v1299_v43 }
  0xed   : > { %1575 = vmatprep.subr.bf16.mxu0 %v5586_v30  ;;  %1616 = vmatprep.subr.bf16.mxu1 %v5588_v31  ;;  %v5651_v30 = vld [vmem:[#allocation5 + $0x190] ss:$8 sps:$4 sm:$0xff]   ;;  %v5656_v31 = vld [vmem:[#allocation5 + $0x1a4] ss:$8 sps:$4 sm:$0xff]  }
  0xef   : > { %4808 = vmatmul.mubr.msk.bf16.vlgmr.msra.gmra.mrb[8].mxu0 %vm504_vm1, %v6491_v29  ;;  %4810 = vmatmul.mubr.msk.bf16.vlgmr.msra.gmra.mrb[8].mxu1 %vm504_vm1, %v6491_v29 }
  0xf0   : > { %1576 = vmatpush1.bf16.msra.mxu0 %v5590_v32  ;;  %1617 = vmatpush1.bf16.msra.mxu1 %v5591_v36  ;;  %v5654_v32 = vld [vmem:[#allocation5 + $0x1a0] ss:$8 sps:$4 sm:$0xff]  }
  0xf1   : > { %4812 = vmatprep.subr.msk.bf16.mxu0 %vm508_vm0, %v5592_v33  ;;  %4814 = vmatprep.subr.msk.bf16.mxu1 %vm508_vm0, %v5594_v34  ;;  %v5657_v33 = vld [vmem:[#allocation5 + $0x1b0] ss:$8 sps:$4 sm:$0xff]   ;;  %v5659_v34 = vld [vmem:[#allocation5 + $0x1b4] ss:$8 sps:$4 sm:$0xff]   ;;  %v5660_v36 = vld [vmem:[#allocation5 + $0x1c0] ss:$8 sps:$4 sm:$0xff]  }
  0xf2   : > { %1607 = vmatprep.mubr.bf16.mxu0 %v6110_v0  ;;  %1648 = vmatprep.mubr.bf16.mxu1 %v6110_v0 }
  0xf4   : > { %1578 = vmatpush1.bf16.msra.mxu0 %v1293_v42  ;;  %1619 = vmatpush1.bf16.msra.mxu1 %v1299_v43  ;;  %v5671_v42 = vld [vmem:[#allocation5 + $0x1f4] ss:$8 sps:$4 sm:$0xff]   ;;  %v5674_v43 = vld [vmem:[#allocation5 + $0x4] ss:$8 sps:$4 sm:$0xff]  }
  0xf5   : > { %1718 = vmatprep.subr.bf16.mxu0 %v5598_v48  ;;  %1759 = vmatprep.subr.bf16.mxu1 %v5600_v49 }
  0xf7   : > { %4813 = vmatmul.mubr.msk.bf16.vlgmr.msra.gmra.mrb[12].mxu0 %vm504_vm1, %v6553_v52  ;;  %4815 = vmatmul.mubr.msk.bf16.vlgmr.msra.gmra.mrb[12].mxu1 %vm504_vm1, %v6553_v52 }
  0xf8   : > { %1719 = vmatpush1.bf16.msra.mxu0 %v5602_v50  ;;  %1760 = vmatpush1.bf16.msra.mxu1 %v5603_v51 }
  0xf9   : > { %4824 = vmatprep.subr.msk.bf16.mxu0 %vm508_vm0, %v5604_v53  ;;  %4826 = vmatprep.subr.msk.bf16.mxu1 %vm508_vm0, %v5606_v54 }
  0xfa   : > { %1750 = vmatprep.mubr.bf16.mxu0 %v6110_v0  ;;  %1791 = vmatprep.mubr.bf16.mxu1 %v6110_v0 }
  0xfc   : > { %1721 = vmatpush1.bf16.msra.mxu0 %v6524_v46  ;;  %1762 = vmatpush1.bf16.msra.mxu1 %v6527_v47 }
  0xfd   : > { %1804 = vmatprep.subr.bf16.mxu0 %v5598_v48  ;;  %1845 = vmatprep.subr.bf16.mxu1 %v5600_v49 }
  0xff   : > { %4825 = vmatmul.mubr.msk.bf16.vlgmr.msra.gmra.mrb[0].mxu0 %vm504_vm1, %v6455_v24  ;;  %4827 = vmatmul.mubr.msk.bf16.vlgmr.msra.gmra.mrb[0].mxu1 %vm504_vm1, %v6455_v24  ;;  %v5642_v24 = vld [vmem:[#allocation5 + $0x160] ss:$8 sps:$4 sm:$0xff]  }
 0x100   : > { %1805 = vmatpush1.bf16.msra.mxu0 %v5602_v50  ;;  %1846 = vmatpush1.bf16.msra.mxu1 %v5603_v51 }
 0x101   : > { %4828 = vmatprep.subr.msk.bf16.mxu0 %vm508_vm0, %v5604_v53  ;;  %4830 = vmatprep.subr.msk.bf16.mxu1 %vm508_vm0, %v5606_v54 }
 0x102   : > { %1836 = vmatprep.mubr.bf16.mxu0 %v6110_v0  ;;  %1877 = vmatprep.mubr.bf16.mxu1 %v6110_v0 }
 0x104   : > { %1807 = vmatpush1.bf16.msra.mxu0 %v6524_v46  ;;  %1848 = vmatpush1.bf16.msra.mxu1 %v6527_v47 }
 0x105   : > { %1890 = vmatprep.subr.bf16.mxu0 %v5598_v48  ;;  %1931 = vmatprep.subr.bf16.mxu1 %v5600_v49 }
 0x107   : > { %4829 = vmatmul.mubr.msk.bf16.vlgmr.msra.gmra.mrb[4].mxu0 %vm504_vm1, %v6491_v29  ;;  %4831 = vmatmul.mubr.msk.bf16.vlgmr.msra.gmra.mrb[4].mxu1 %vm504_vm1, %v6491_v29 }
 0x108   : > { %1891 = vmatpush1.bf16.msra.mxu0 %v5602_v50  ;;  %1932 = vmatpush1.bf16.msra.mxu1 %v5603_v51 }
 0x109   : > { %4832 = vmatprep.subr.msk.bf16.mxu0 %vm508_vm0, %v5604_v53  ;;  %4834 = vmatprep.subr.msk.bf16.mxu1 %vm508_vm0, %v5606_v54 }
 0x10a   : > { %1922 = vmatprep.mubr.bf16.mxu0 %v6110_v0  ;;  %1963 = vmatprep.mubr.bf16.mxu1 %v6110_v0 }
 0x10c   : > { %1893 = vmatpush1.bf16.msra.mxu0 %v6524_v46  ;;  %1934 = vmatpush1.bf16.msra.mxu1 %v6527_v47 }
 0x10d   : > { %1989 = vmatprep.subr.bf16.mxu0 %v5598_v48  ;;  %2030 = vmatprep.subr.bf16.mxu1 %v5600_v49  ;;  %v2498_v49 = vshrl.u32 %v2497_v44, 7 }
 0x10f   : > { %4833 = vmatmul.mubr.msk.bf16.vlgmr.msra.gmra.mrb[8].mxu0 %vm504_vm1, %v6553_v52  ;;  %4835 = vmatmul.mubr.msk.bf16.vlgmr.msra.gmra.mrb[8].mxu1 %vm504_vm1, %v6553_v52  ;;  %v2503_v56 = vsub.s32 1, %v2498_v49 }
 0x110   : > { %1990 = vmatpush1.bf16.msra.mxu0 %v5602_v50  ;;  %2031 = vmatpush1.bf16.msra.mxu1 %v5603_v51 }
 0x111   : > { %4837 = vmatprep.subr.msk.bf16.mxu0 %vm508_vm0, %v5604_v53  ;;  %4839 = vmatprep.subr.msk.bf16.mxu1 %vm508_vm0, %v5606_v54  ;;  %v2499_v54 = vsub.s32 0, %v2498_v49  ;;  %v2504_v3 = vrot.slane %v2495_v55, %v2503_v56  ;;  %v5680_v49 = vld [vmem:[#allocation5 + $0x24] ss:$8 sps:$4 sm:$0xff]   ;;  %v5683_v56 = vld [vmem:[#allocation5 + $0x34] ss:$8 sps:$4 sm:$0xff]  }
 0x112   : > { %2021 = vmatprep.mubr.bf16.mxu0 %v6110_v0  ;;  %2062 = vmatprep.mubr.bf16.mxu1 %v6110_v0 }
 0x114   : > { %1992 = vmatpush1.bf16.msra.mxu0 %v6524_v46  ;;  %2033 = vmatpush1.bf16.msra.mxu1 %v6527_v47 }
 0x115   : > { %2132 = vmatprep.subr.bf16.mxu0 %v5611_v59  ;;  %2173 = vmatprep.subr.bf16.mxu1 %v5613_v60 }
 0x117   : > { %4838 = vmatmul.mubr.msk.bf16.vlgmr.msra.gmra.mrb[12].mxu0 %vm504_vm1, %v1985_v61  ;;  %4840 = vmatmul.mubr.msk.bf16.vlgmr.msra.gmra.mrb[12].mxu1 %vm504_vm1, %v1985_v61 }
 0x118   : > { %2133 = vmatpush1.bf16.msra.mxu0 %v5615_v62  ;;  %2174 = vmatpush1.bf16.msra.mxu1 %v5616_v63 }
 0x119   : > { %4849 = vmatprep.subr.msk.bf16.mxu0 %vm508_vm0, %v5617_v1  ;;  %4851 = vmatprep.subr.msk.bf16.mxu1 %vm508_vm0, %v5619_v2 }
 0x11a   : > { %2164 = vmatprep.mubr.bf16.mxu0 %v6110_v0  ;;  %2205 = vmatprep.mubr.bf16.mxu1 %v6110_v0 }
 0x11c   : > { %2135 = vmatpush1.bf16.msra.mxu0 %v2121_v5  ;;  %2176 = vmatpush1.bf16.msra.mxu1 %v2127_v6 }
 0x11d   : > { %2218 = vmatprep.subr.bf16.mxu0 %v5611_v59  ;;  %2259 = vmatprep.subr.bf16.mxu1 %v5613_v60 }
 0x11f   : > { %4850 = vmatmul.mubr.msk.bf16.vlgmr.msra.gmra.mrb[0].mxu0 %vm504_vm1, %v6491_v29  ;;  %4852 = vmatmul.mubr.msk.bf16.vlgmr.msra.gmra.mrb[0].mxu1 %vm504_vm1, %v6491_v29  ;;  %v5653_v29 = vld [vmem:[#allocation5 + $0x194] ss:$8 sps:$4 sm:$0xff]  }
 0x120   : > { %2219 = vmatpush1.bf16.msra.mxu0 %v5615_v62  ;;  %2260 = vmatpush1.bf16.msra.mxu1 %v5616_v63 }
 0x121   : > { %4853 = vmatprep.subr.msk.bf16.mxu0 %vm508_vm0, %v5617_v1  ;;  %4855 = vmatprep.subr.msk.bf16.mxu1 %vm508_vm0, %v5619_v2 }
 0x122   : > { %2250 = vmatprep.mubr.bf16.mxu0 %v6110_v0  ;;  %2291 = vmatprep.mubr.bf16.mxu1 %v6110_v0 }
 0x124   : > { %2221 = vmatpush1.bf16.msra.mxu0 %v2121_v5  ;;  %2262 = vmatpush1.bf16.msra.mxu1 %v2127_v6 }
 0x125   : > { %2304 = vmatprep.subr.bf16.mxu0 %v5611_v59  ;;  %2345 = vmatprep.subr.bf16.mxu1 %v5613_v60 }
 0x127   : > { %4854 = vmatmul.mubr.msk.bf16.vlgmr.msra.gmra.mrb[4].mxu0 %vm504_vm1, %v6553_v52  ;;  %4856 = vmatmul.mubr.msk.bf16.vlgmr.msra.gmra.mrb[4].mxu1 %vm504_vm1, %v6553_v52 }
 0x128   : > { %2305 = vmatpush1.bf16.msra.mxu0 %v5615_v62  ;;  %2346 = vmatpush1.bf16.msra.mxu1 %v5616_v63 }
 0x129   : > { %4857 = vmatprep.subr.msk.bf16.mxu0 %vm508_vm0, %v5617_v1  ;;  %4859 = vmatprep.subr.msk.bf16.mxu1 %vm508_vm0, %v5619_v2 }
 0x12a   : > { %2336 = vmatprep.mubr.bf16.mxu0 %v6110_v0  ;;  %2377 = vmatprep.mubr.bf16.mxu1 %v6110_v0 }
 0x12c   : > { %2307 = vmatpush1.bf16.msra.mxu0 %v2121_v5  ;;  %2348 = vmatpush1.bf16.msra.mxu1 %v2127_v6 }
 0x12d   : > { %2403 = vmatprep.subr.bf16.mxu0 %v5611_v59  ;;  %2444 = vmatprep.subr.bf16.mxu1 %v5613_v60 }
 0x12f   : > { %4858 = vmatmul.mubr.msk.bf16.vlgmr.msra.gmra.mrb[8].mxu0 %vm504_vm1, %v1985_v61  ;;  %4860 = vmatmul.mubr.msk.bf16.vlgmr.msra.gmra.mrb[8].mxu1 %vm504_vm1, %v1985_v61  ;;  %v2500_v61 = vrot.slane %v2495_v55, %v2499_v54 }
 0x130   : > { %2404 = vmatpush1.bf16.msra.mxu0 %v5615_v62  ;;  %2445 = vmatpush1.bf16.msra.mxu1 %v5616_v63 }
 0x131   : > { %4862 = vmatprep.subr.msk.bf16.mxu0 %vm508_vm0, %v5617_v1  ;;  %4864 = vmatprep.subr.msk.bf16.mxu1 %vm508_vm0, %v5619_v2 }
 0x132   : > { %2435 = vmatprep.mubr.bf16.mxu0 %v6110_v0  ;;  %2476 = vmatprep.mubr.bf16.mxu1 %v6110_v0  ;;  %v5635_v0 = vld [vmem:[#allocation5 + $0x134] ss:$8 sps:$4 sm:$0xff]  }
 0x134   : > { %2406 = vmatpush1.bf16.msra.mxu0 %v2121_v5  ;;  %2447 = vmatpush1.bf16.msra.mxu1 %v2127_v6 }
 0x135   : > { %3008 = vmatprep.subr.bf16.mxu1 %v5626_v11  ;;  %2750 = vmatprep.subr.bf16.mxu0 %v5626_v11 }
 0x137   : > { %4863 = vmatmul.mubr.msk.bf16.vlgmr.msra.gmra.mrb[12].mxu0 %vm504_vm1, %v2399_v12  ;;  %4865 = vmatmul.mubr.msk.bf16.vlgmr.msra.gmra.mrb[12].mxu1 %vm504_vm1, %v2399_v12 }
 0x138   : > { %3009 = vmatpush1.bf16.msra.mxu1 %v5624_v13  ;;  %2751 = vmatpush1.bf16.msra.mxu0 %v5624_v13 }
 0x139   : > { %3010 = vmatprep.subr.bf16.mxu1 %v5629_v14  ;;  %2752 = vmatprep.subr.bf16.mxu0 %v5629_v14 }
 0x13c   : > { %3011 = vmatpush1.bf16.msra.mxu1 %v5627_v15  ;;  %2753 = vmatpush1.bf16.msra.mxu0 %v5627_v15 }
 0x13d   : > { %3012 = vmatprep.subr.bf16.mxu1 %v5632_v16  ;;  %2754 = vmatprep.subr.bf16.mxu0 %v5632_v16 }
 0x140   : > { %3013 = vmatpush1.bf16.msra.mxu1 %v5630_v17  ;;  %2755 = vmatpush1.bf16.msra.mxu0 %v5630_v17 }
 0x141   : > { %3014 = vmatprep.subr.bf16.mxu1 %v5635_v0  ;;  %2756 = vmatprep.subr.bf16.mxu0 %v5635_v0 }
 0x144   : > { %3015 = vmatpush1.bf16.msra.mxu1 %v5633_v18  ;;  %2757 = vmatpush1.bf16.msra.mxu0 %v5633_v18 }
 0x145   : > { %3016 = vmatprep.subr.bf16.mxu1 %v5638_v19  ;;  %2758 = vmatprep.subr.bf16.mxu0 %v5638_v19 }
 0x148   : > { %3017 = vmatpush1.bf16.msra.mxu1 %v5636_v20  ;;  %2759 = vmatpush1.bf16.msra.mxu0 %v5636_v20 }
 0x149   : > { %3018 = vmatprep.subr.bf16.mxu1 %v5641_v21  ;;  %2760 = vmatprep.subr.bf16.mxu0 %v5641_v21 }
 0x14c   : > { %3019 = vmatpush1.bf16.msra.mxu1 %v5639_v22  ;;  %2761 = vmatpush1.bf16.msra.mxu0 %v5639_v22 }
 0x14d   : > { %3020 = vmatprep.subr.bf16.mxu1 %v5644_v23  ;;  %2762 = vmatprep.subr.bf16.mxu0 %v5644_v23 }
 0x150   : > { %3021 = vmatpush1.bf16.msra.mxu1 %v5642_v24  ;;  %2763 = vmatpush1.bf16.msra.mxu0 %v5642_v24 }
 0x151   : > { %3022 = vmatprep.subr.bf16.mxu1 %v5647_v25  ;;  %2764 = vmatprep.subr.bf16.mxu0 %v5647_v25 }
 0x154   : > { %3023 = vmatpush1.bf16.msra.mxu1 %v5645_v26  ;;  %2765 = vmatpush1.bf16.msra.mxu0 %v5645_v26 }
 0x155   : > { %3024 = vmatprep.subr.bf16.mxu1 %v5650_v27  ;;  %2766 = vmatprep.subr.bf16.mxu0 %v5650_v27 }
 0x158   : > { %3025 = vmatpush1.bf16.msra.mxu1 %v5648_v28  ;;  %2767 = vmatpush1.bf16.msra.mxu0 %v5648_v28 }
 0x159   : > { %3026 = vmatprep.subr.bf16.mxu1 %v5653_v29  ;;  %2768 = vmatprep.subr.bf16.mxu0 %v5653_v29 }
 0x15c   : > { %3027 = vmatpush1.bf16.msra.mxu1 %v5651_v30  ;;  %2769 = vmatpush1.bf16.msra.mxu0 %v5651_v30 }
 0x15d   : > { %3028 = vmatprep.subr.bf16.mxu1 %v5656_v31  ;;  %2770 = vmatprep.subr.bf16.mxu0 %v5656_v31 }
 0x160   : > { %3029 = vmatpush1.bf16.msra.mxu1 %v5654_v32  ;;  %2771 = vmatpush1.bf16.msra.mxu0 %v5654_v32  ;;  %v5672_v32 = vld [vmem:[#allocation5] ss:$8 sps:$4 sm:$0xff]  }
 0x161   : > { %3030 = vmatprep.subr.bf16.mxu1 %v5659_v34  ;;  %2772 = vmatprep.subr.bf16.mxu0 %v5659_v34 }
 0x164   : > { %3031 = vmatpush1.bf16.msra.mxu1 %v5657_v33  ;;  %2773 = vmatpush1.bf16.msra.mxu0 %v5657_v33 }
 0x165   : > { %3032 = vmatprep.subr.bf16.mxu1 %v5662_v35  ;;  %2774 = vmatprep.subr.bf16.mxu0 %v5662_v35 }
 0x168   : > { %3033 = vmatpush1.bf16.msra.mxu1 %v5660_v36  ;;  %2775 = vmatpush1.bf16.msra.mxu0 %v5660_v36 }
 0x169   : > { %3034 = vmatprep.subr.bf16.mxu1 %v5665_v37  ;;  %2776 = vmatprep.subr.bf16.mxu0 %v5665_v37 }
 0x16c   : > { %3035 = vmatpush1.bf16.msra.mxu1 %v5663_v38  ;;  %2777 = vmatpush1.bf16.msra.mxu0 %v5663_v38  ;;  %v5677_v38 = vld [vmem:[#allocation5 + $0x14] ss:$8 sps:$4 sm:$0xff]  }
 0x16d   : > { %3036 = vmatprep.subr.bf16.mxu1 %v5668_v39  ;;  %2778 = vmatprep.subr.bf16.mxu0 %v5668_v39 }
 0x170   : > { %3037 = vmatpush1.bf16.msra.mxu1 %v5666_v40  ;;  %2779 = vmatpush1.bf16.msra.mxu0 %v5666_v40 }
 0x171   : > { %3038 = vmatprep.subr.bf16.mxu1 %v5671_v42  ;;  %2780 = vmatprep.subr.bf16.mxu0 %v5671_v42 }
 0x174   : > { %3039 = vmatpush1.bf16.msra.mxu1 %v5669_v41  ;;  %2781 = vmatpush1.bf16.msra.mxu0 %v5669_v41 }
 0x175   : > { %3049 = vmatprep.subr.bf16.mxu1 %v5674_v43  ;;  %2951 = vmatprep.subr.bf16.mxu0 %v5674_v43 }
 0x1f2   : > { %v2166_v45 = vpop.f32.mrb[0].mxu0  ;;  %v2207_v46 = vpop.f32.mrb[0].mxu1 }
 0x1f3   : > { %v2168_v47 = vpop.f32.mrb[1].mxu0  ;;  %v2209_v48 = vpop.f32.mrb[1].mxu1 }
 0x1f4   : > { %v2170_v50 = vpop.f32.mrb[2].mxu0  ;;  %v2211_v51 = vpop.f32.mrb[2].mxu1 }
 0x1f5   : > { %v2171_v52 = vpop.f32.mrb[3].mxu0  ;;  %v2212_v53 = vpop.f32.mrb[3].mxu1 }
 0x1f6   : > { %v5678_v53 = vld [vmem:[#allocation5 + $0x20] ss:$8 sps:$4 sm:$0xff]  }
 0x1fa   : > { %v2252_v57 = vpop.f32.mrb[4].mxu0  ;;  %v2293_v58 = vpop.f32.mrb[4].mxu1 }
 0x1fb   : > { %v2489_v59 = vmax.f32 %v2166_v45, %v2252_v57  ;;  %v2491_v60 = vmax.f32 %v2207_v46, %v2293_v58  ;;  %v2254_v62 = vpop.f32.mrb[5].mxu0  ;;  %v2295_v63 = vpop.f32.mrb[5].mxu1  ;;  %v5681_v57 = vld [vmem:[#allocation5 + $0x30] ss:$8 sps:$4 sm:$0xff]   ;;  %v5686_v58 = vld [vmem:[#allocation5 + $0x44] ss:$8 sps:$4 sm:$0xff]  }
 0x1fc   : > { %v2490_v1 = vmax.f32 %v2168_v47, %v2254_v62  ;;  %v2492_v2 = vmax.f32 %v2209_v48, %v2295_v63  ;;  %v2256_v4 = vpop.f32.mrb[6].mxu0  ;;  %v2297_v5 = vpop.f32.mrb[6].mxu1  ;;  %v5675_v47 = vld [vmem:[#allocation5 + $0x10] ss:$8 sps:$4 sm:$0xff]   ;;  %v5692_v62 = vld [vmem:[#allocation5 + $0x64] ss:$8 sps:$4 sm:$0xff]  }
 0x1fd   : > { %v2493_v6 = vmax.f32 %v2489_v59, %v2491_v60  ;;  %v2257_v7 = vpop.f32.mrb[7].mxu0  ;;  %v2298_v8 = vpop.f32.mrb[7].mxu1  ;;  %v5684_v59 = vld [vmem:[#allocation5 + $0x40] ss:$8 sps:$4 sm:$0xff]   ;;  %v5689_v60 = vld [vmem:[#allocation5 + $0x54] ss:$8 sps:$4 sm:$0xff]  }
 0x1fe   : > { %v2494_v9 = vmax.f32 %v2490_v1, %v2492_v2  ;;  %v5690_v63 = vld [vmem:[#allocation5 + $0x60] ss:$8 sps:$4 sm:$0xff]   ;;  %v5695_v1 = vld [vmem:[#allocation5 + $0x74] ss:$8 sps:$4 sm:$0xff]   ;;  %v5693_v2 = vld [vmem:[#allocation5 + $0x70] ss:$8 sps:$4 sm:$0xff]  }
 0x1ff   : > { %v2507_v10 = vadd.f32 %v2500_v61, %v2493_v6  ;;  %v5696_v4 = vld [vmem:[#allocation5 + $0x80] ss:$8 sps:$4 sm:$0xff]   ;;  %v5701_v5 = vld [vmem:[#allocation5 + $0x94] ss:$8 sps:$4 sm:$0xff]   ;;  %v5699_v6 = vld [vmem:[#allocation5 + $0x90] ss:$8 sps:$4 sm:$0xff]  }
 0x200   : > { %v2508_v11 = vadd.f32 %v2504_v3, %v2494_v9  ;;  %v5704_v7 = vld [vmem:[#allocation5 + $0xa4] ss:$8 sps:$4 sm:$0xff]   ;;  %v5702_v8 = vld [vmem:[#allocation5 + $0xa0] ss:$8 sps:$4 sm:$0xff]   ;;  %v5707_v9 = vld [vmem:[#allocation5 + $0xb4] ss:$8 sps:$4 sm:$0xff]  }
 0x201   : > { %v2509_v12 = vmax.f32 %v2507_v10, 0.0  ;;  %v5705_v10 = vld [vmem:[#allocation5 + $0xb0] ss:$8 sps:$4 sm:$0xff]  }
 0x202   : > { %v2510_v13 = vmax.f32 %v2508_v11, 0.0  ;;  %v2338_v14 = vpop.f32.mrb[8].mxu0  ;;  %v2379_v15 = vpop.f32.mrb[8].mxu1  ;;  %v5710_v11 = vld [vmem:[#allocation5 + $0xc4] ss:$8 sps:$4 sm:$0xff]  }
 0x203   : > { %v6634_v16 = vpack.c.bf16 %v2509_v12, %v2509_v12  ;;  %v2340_v17 = vpop.f32.mrb[9].mxu0  ;;  %v2381_v0 = vpop.f32.mrb[9].mxu1  ;;  %v5708_v12 = vld [vmem:[#allocation5 + $0xc0] ss:$8 sps:$4 sm:$0xff]  }
 0x204   : > { %v6636_v18 = vpack.c.bf16 %v2510_v13, %v2510_v13  ;;  %v2342_v19 = vpop.f32.mrb[10].mxu0  ;;  %v2383_v20 = vpop.f32.mrb[10].mxu1  ;;  %v5713_v13 = vld [vmem:[#allocation5 + $0xd4] ss:$8 sps:$4 sm:$0xff]  }
 0x205   : > { %v2343_v21 = vpop.f32.mrb[11].mxu0  ;;  %v2384_v22 = vpop.f32.mrb[11].mxu1  ;;  %v2995_v23 = vshll.u32 %v6634_v16, 16  ;;  %v2993_v28 = vshrl.u32 %v6634_v16, 16  ;;  %v5717_v20 = vld [vmem:[#allocation5 + $0xf0] ss:$8 sps:$4 sm:$0xff]  }
 0x206   : > { %v3002_v24 = vshll.u32 %v6636_v18, 16  ;;  %v3000_v26 = vshrl.u32 %v6636_v18, 16  ;;  %v5722_v21 = vld [vmem:[#allocation5 + $0x204] ss:$8 sps:$4 sm:$0xff]  }
 0x207   : > { %v2997_v25 = vrot.slane %v2995_v23, 1  ;;  %v5720_v23 = vld [vmem:[#allocation5 + $0x200] ss:$8 sps:$4 sm:$0xff]  }
 0x208   : > { %v3004_v27 = vrot.slane %v3002_v24, 1 }
 0x209   : > { %v6644_v37 = vor.u32 %v2997_v25, %v2993_v28  ;;  %v5725_v25 = vld [vmem:[#allocation5 + $0x214] ss:$8 sps:$4 sm:$0xff]   ;;  %v5728_v28 = vld [vmem:[#allocation5 + $0x224] ss:$8 sps:$4 sm:$0xff]  }
 0x20a   : > { %v2437_v29 = vpop.f32.mrb[12].mxu0  ;;  %v2478_v30 = vpop.f32.mrb[12].mxu1  ;;  %v6642_v31 = vor.u32 %v3004_v27, %v3000_v26  ;;  %v5723_v27 = vld [vmem:[#allocation5 + $0x210] ss:$8 sps:$4 sm:$0xff]  }
 0x20b   : > { %v2513_v33 = vmax.f32 %v2338_v14, %v2437_v29  ;;  %v2515_v34 = vmax.f32 %v2379_v15, %v2478_v30  ;;  %v2439_v35 = vpop.f32.mrb[13].mxu0  ;;  %v2480_v36 = vpop.f32.mrb[13].mxu1  ;;  %v5711_v14 = vld [vmem:[#allocation5 + $0xd0] ss:$8 sps:$4 sm:$0xff]   ;;  %v5716_v15 = vld [vmem:[#allocation5 + $0xe4] ss:$8 sps:$4 sm:$0xff]  }
 0x20c   : > { %v2514_v39 = vmax.f32 %v2340_v17, %v2439_v35  ;;  %v2516_v40 = vmax.f32 %v2381_v0, %v2480_v36  ;;  %v2441_v41 = vpop.f32.mrb[14].mxu0  ;;  %v2482_v42 = vpop.f32.mrb[14].mxu1  ;;  %3040 = vmatprep.mubr.bf16.mxu1 %v6642_v31  ;;  %v5714_v17 = vld [vmem:[#allocation5 + $0xe0] ss:$8 sps:$4 sm:$0xff]   ;;  %v5719_v0 = vld [vmem:[#allocation5 + $0xf4] ss:$8 sps:$4 sm:$0xff]  }
 0x20d   : > { %v2517_v43 = vmax.f32 %v2513_v33, %v2515_v34  ;;  %v2442_v44 = vpop.f32.mrb[15].mxu0  ;;  %v2483_v45 = vpop.f32.mrb[15].mxu1  ;;  %3041 = vmatmul.mubr.bf16.vlgmr.msra.gmra.mrb[16].mxu1 %v6644_v37  ;;  %v5726_v29 = vld [vmem:[#allocation5 + $0x220] ss:$8 sps:$4 sm:$0xff]   ;;  %v5731_v30 = vld [vmem:[#allocation5 + $0x234] ss:$8 sps:$4 sm:$0xff]  }
 0x20e   : > { %v2518_v46 = vmax.f32 %v2514_v39, %v2516_v40  ;;  %3050 = vmatpush1.bf16.msra.mxu1 %v5672_v32  ;;  %v5734_v33 = vld [vmem:[#allocation5 + $0x244] ss:$8 sps:$4 sm:$0xff]   ;;  %v5732_v34 = vld [vmem:[#allocation5 + $0x240] ss:$8 sps:$4 sm:$0xff]   ;;  %v5737_v35 = vld [vmem:[#allocation5 + $0x254] ss:$8 sps:$4 sm:$0xff]  }
 0x20f   : > { %v2519_v48 = vadd.f32 %v2517_v43, %v2500_v61  ;;  %3051 = vmatprep.subr.bf16.mxu1 %v5677_v38  ;;  %v5687_v61 = vld [vmem:[#allocation5 + $0x50] ss:$8 sps:$4 sm:$0xff]   ;;  %v5738_v39 = vld [vmem:[#allocation5 + $0x260] ss:$8 sps:$4 sm:$0xff]   ;;  %v5743_v40 = vld [vmem:[#allocation5 + $0x274] ss:$8 sps:$4 sm:$0xff]  }
 0x210   : > { %v2520_v50 = vadd.f32 %v2518_v46, %v2504_v3  ;;  %v5698_v3 = vld [vmem:[#allocation5 + $0x84] ss:$8 sps:$4 sm:$0xff]   ;;  %v5735_v36 = vld [vmem:[#allocation5 + $0x250] ss:$8 sps:$4 sm:$0xff]   ;;  %v5744_v42 = vld [vmem:[#allocation5 + $0x280] ss:$8 sps:$4 sm:$0xff]  }
 0x211   : > { %v2521_v51 = vmax.f32 %v2519_v48, 0.0  ;;  %v5746_v41 = vld [vmem:[#allocation5 + $0x284] ss:$8 sps:$4 sm:$0xff]   ;;  %v5749_v43 = vld [vmem:[#allocation5 + $0x294] ss:$8 sps:$4 sm:$0xff]  }
 0x212   : > { %v2522_v52 = vmax.f32 %v2520_v50, 0.0  ;;  %3052 = vmatpush1.bf16.msra.mxu1 %v5675_v47  ;;  %v5747_v44 = vld [vmem:[#allocation5 + $0x290] ss:$8 sps:$4 sm:$0xff]   ;;  %v5752_v45 = vld [vmem:[#allocation5 + $0x2a4] ss:$8 sps:$4 sm:$0xff]  }
 0x213   : > { %3053 = vmatprep.subr.bf16.mxu1 %v5680_v49  ;;  %v6650_v55 = vpack.c.bf16 %v2521_v51, %v2521_v51  ;;  %v5750_v46 = vld [vmem:[#allocation5 + $0x2a0] ss:$8 sps:$4 sm:$0xff]   ;;  %v5753_v48 = vld [vmem:[#allocation5 + $0x2b0] ss:$8 sps:$4 sm:$0xff]   ;;  %v5761_v51 = vld [vmem:[#allocation5 + $0x2d4] ss:$8 sps:$4 sm:$0xff]  }
 0x214   : > { %v6648_v54 = vpack.c.bf16 %v2522_v52, %v2522_v52  ;;  %v5756_v50 = vld [vmem:[#allocation5 + $0x2c0] ss:$8 sps:$4 sm:$0xff]   ;;  %v5759_v52 = vld [vmem:[#allocation5 + $0x2d0] ss:$8 sps:$4 sm:$0xff]  }
 0x216   : > { %3054 = vmatpush1.bf16.msra.mxu1 %v5678_v53  ;;  %2782 = vmatprep.mubr.bf16.mxu0 %v6648_v54  ;;  %v3336_v19 = vshll.u32 %v6648_v54, 16  ;;  %v3334_v24 = vshrl.u32 %v6648_v54, 16 }
 0x217   : > { %3081 = vmatprep.mubr.bf16.mxu1 %v6648_v54  ;;  %2783 = vmatmul.mubr.bf16.vlgmr.msra.gmra.mrb[16].mxu0 %v6650_v55 }
 0x218   : > { %2952 = vmatpush1.bf16.msra.mxu0 %v5672_v32  ;;  %2983 = vmatprep.mubr.bf16.mxu0 %v6636_v18  ;;  %v3338_v22 = vrot.slane %v3336_v19, 1  ;;  %v5729_v32 = vld [vmem:[#allocation5 + $0x230] ss:$8 sps:$4 sm:$0xff]   ;;  %v5797_v19 = vld [vmem:[#allocation5 + $0x394] ss:$8 sps:$4 sm:$0xff]  }
 0x219   : > { %3055 = vmatprep.subr.bf16.mxu1 %v5683_v56  ;;  %2953 = vmatprep.subr.bf16.mxu0 %v5677_v38  ;;  %v5740_v38 = vld [vmem:[#allocation5 + $0x264] ss:$8 sps:$4 sm:$0xff]  }
 0x21a   : > { %3056 = vmatpush1.bf16.msra.mxu1 %v5681_v57  ;;  %v6658_v26 = vor.u32 %v3338_v22, %v3334_v24  ;;  %v5798_v22 = vld [vmem:[#allocation5 + $0x3a0] ss:$8 sps:$4 sm:$0xff]   ;;  %v5801_v24 = vld [vmem:[#allocation5 + $0x3b0] ss:$8 sps:$4 sm:$0xff]  }
 0x21b   : > { %3057 = vmatprep.subr.bf16.mxu1 %v5686_v58 }
 0x21c   : > { %2954 = vmatpush1.bf16.msra.mxu0 %v5675_v47  ;;  %v5755_v47 = vld [vmem:[#allocation5 + $0x2b4] ss:$8 sps:$4 sm:$0xff]  }
 0x21d   : > { %2955 = vmatprep.subr.bf16.mxu0 %v5680_v49  ;;  %v5758_v49 = vld [vmem:[#allocation5 + $0x2c4] ss:$8 sps:$4 sm:$0xff]  }
 0x21e   : > { %3058 = vmatpush1.bf16.msra.mxu1 %v5684_v59 }
 0x21f   : > { %3059 = vmatprep.subr.bf16.mxu1 %v5689_v60 }
 0x220   : > { %2956 = vmatpush1.bf16.msra.mxu0 %v5678_v53  ;;  %v5764_v53 = vld [vmem:[#allocation5 + $0x2e4] ss:$8 sps:$4 sm:$0xff]  }
 0x221   : > { %2957 = vmatprep.subr.bf16.mxu0 %v5683_v56  ;;  %v5762_v56 = vld [vmem:[#allocation5 + $0x2e0] ss:$8 sps:$4 sm:$0xff]  }
 0x222   : > { %3060 = vmatpush1.bf16.msra.mxu1 %v5687_v61 }
 0x223   : > { %3061 = vmatprep.subr.bf16.mxu1 %v5692_v62 }
 0x224   : > { %2958 = vmatpush1.bf16.msra.mxu0 %v5681_v57  ;;  %v5767_v57 = vld [vmem:[#allocation5 + $0x2f4] ss:$8 sps:$4 sm:$0xff]  }
 0x225   : > { %2959 = vmatprep.subr.bf16.mxu0 %v5686_v58  ;;  %v3329_v58 = vshll.u32 %v6650_v55, 16 }
 0x226   : > { %3062 = vmatpush1.bf16.msra.mxu1 %v5690_v63 }
 0x227   : > { %3063 = vmatprep.subr.bf16.mxu1 %v5695_v1 }
 0x228   : > { %2960 = vmatpush1.bf16.msra.mxu0 %v5684_v59  ;;  %v5765_v59 = vld [vmem:[#allocation5 + $0x2f0] ss:$8 sps:$4 sm:$0xff]  }
 0x229   : > { %2961 = vmatprep.subr.bf16.mxu0 %v5689_v60  ;;  %v3331_v60 = vrot.slane %v3329_v58, 1  ;;  %v5851_v58 = vld [vmem:[#allocation5 + $0x4b4] ss:$8 sps:$4 sm:$0xff]  }
 0x22a   : > { %3064 = vmatpush1.bf16.msra.mxu1 %v5693_v2 }
 0x22b   : > { %3065 = vmatprep.subr.bf16.mxu1 %v5698_v3 }
 0x22c   : > { %2962 = vmatpush1.bf16.msra.mxu0 %v5687_v61  ;;  %v5770_v61 = vld [vmem:[#allocation5 + $0x304] ss:$8 sps:$4 sm:$0xff]  }
 0x22d   : > { %2963 = vmatprep.subr.bf16.mxu0 %v5692_v62  ;;  %v3327_v62 = vshrl.u32 %v6650_v55, 16 }
 0x22e   : > { %3066 = vmatpush1.bf16.msra.mxu1 %v5696_v4 }
 0x22f   : > { %3067 = vmatprep.subr.bf16.mxu1 %v5701_v5 }
 0x230   : > { %2964 = vmatpush1.bf16.msra.mxu0 %v5690_v63  ;;  %v5768_v63 = vld [vmem:[#allocation5 + $0x300] ss:$8 sps:$4 sm:$0xff]  }
 0x231   : > { %2965 = vmatprep.subr.bf16.mxu0 %v5695_v1  ;;  %v6666_v1 = vor.u32 %v3331_v60, %v3327_v62  ;;  %v5854_v60 = vld [vmem:[#allocation5 + $0x4c4] ss:$8 sps:$4 sm:$0xff]   ;;  %v5857_v62 = vld [vmem:[#allocation5 + $0x4d4] ss:$8 sps:$4 sm:$0xff]  }
 0x232   : > { %3068 = vmatpush1.bf16.msra.mxu1 %v5699_v6 }
 0x233   : > { %3069 = vmatprep.subr.bf16.mxu1 %v5704_v7 }
 0x234   : > { %2966 = vmatpush1.bf16.msra.mxu0 %v5693_v2  ;;  %v5773_v2 = vld [vmem:[#allocation5 + $0x314] ss:$8 sps:$4 sm:$0xff]  }
 0x235   : > { %2967 = vmatprep.subr.bf16.mxu0 %v5698_v3  ;;  %v3624_v3 = vrot.slane %v6636_v18, 1  ;;  %v5837_v18 = vld [vmem:[#allocation5 + $0x470] ss:$8 sps:$4 sm:$0xff]  }
 0x236   : > { %3070 = vmatpush1.bf16.msra.mxu1 %v5702_v8 }
 0x237   : > { %3071 = vmatprep.subr.bf16.mxu1 %v5707_v9 }
 0x238   : > { %2968 = vmatpush1.bf16.msra.mxu0 %v5696_v4  ;;  %v5771_v4 = vld [vmem:[#allocation5 + $0x310] ss:$8 sps:$4 sm:$0xff]  }
 0x239   : > { %2969 = vmatprep.subr.bf16.mxu0 %v5701_v5  ;;  %v5776_v5 = vld [vmem:[#allocation5 + $0x324] ss:$8 sps:$4 sm:$0xff]  }
 0x23a   : > { %3072 = vmatpush1.bf16.msra.mxu1 %v5705_v10 }
 0x23b   : > { %3073 = vmatprep.subr.bf16.mxu1 %v5710_v11 }
 0x23c   : > { %2970 = vmatpush1.bf16.msra.mxu0 %v5699_v6  ;;  %v5774_v6 = vld [vmem:[#allocation5 + $0x320] ss:$8 sps:$4 sm:$0xff]  }
 0x23d   : > { %2971 = vmatprep.subr.bf16.mxu0 %v5704_v7  ;;  %v5779_v7 = vld [vmem:[#allocation5 + $0x334] ss:$8 sps:$4 sm:$0xff]  }
 0x23e   : > { %3074 = vmatpush1.bf16.msra.mxu1 %v5708_v12 }
 0x23f   : > { %3075 = vmatprep.subr.bf16.mxu1 %v5713_v13 }
 0x240   : > { %2972 = vmatpush1.bf16.msra.mxu0 %v5702_v8  ;;  %v5777_v8 = vld [vmem:[#allocation5 + $0x330] ss:$8 sps:$4 sm:$0xff]  }
 0x241   : > { %2973 = vmatprep.subr.bf16.mxu0 %v5707_v9  ;;  %v5782_v9 = vld [vmem:[#allocation5 + $0x344] ss:$8 sps:$4 sm:$0xff]  }
 0x242   : > { %3076 = vmatpush1.bf16.msra.mxu1 %v5711_v14 }
 0x243   : > { %3077 = vmatprep.subr.bf16.mxu1 %v5716_v15 }
 0x244   : > { %2974 = vmatpush1.bf16.msra.mxu0 %v5705_v10  ;;  %v5780_v10 = vld [vmem:[#allocation5 + $0x340] ss:$8 sps:$4 sm:$0xff]  }
 0x245   : > { %2975 = vmatprep.subr.bf16.mxu0 %v5710_v11  ;;  %v5785_v11 = vld [vmem:[#allocation5 + $0x354] ss:$8 sps:$4 sm:$0xff]  }
 0x246   : > { %3078 = vmatpush1.bf16.msra.mxu1 %v5714_v17 }
 0x247   : > { %3079 = vmatprep.subr.bf16.mxu1 %v5719_v0 }
 0x248   : > { %2976 = vmatpush1.bf16.msra.mxu0 %v5708_v12  ;;  %v5783_v12 = vld [vmem:[#allocation5 + $0x350] ss:$8 sps:$4 sm:$0xff]  }
 0x249   : > { %2977 = vmatprep.subr.bf16.mxu0 %v5713_v13  ;;  %v5788_v13 = vld [vmem:[#allocation5 + $0x364] ss:$8 sps:$4 sm:$0xff]  }
 0x24a   : > { %3080 = vmatpush1.bf16.msra.mxu1 %v5717_v20 }
 0x24b   : > { %3342 = vmatprep.subr.bf16.mxu1 %v5722_v21 }
 0x24c   : > { %2978 = vmatpush1.bf16.msra.mxu0 %v5711_v14  ;;  %v5791_v14 = vld [vmem:[#allocation5 + $0x374] ss:$8 sps:$4 sm:$0xff]  }
 0x24d   : > { %3082 = vmatmul.mubr.bf16.vlgmr.msra.gmra.mrb[16].mxu1 %v6650_v55  ;;  %2979 = vmatprep.subr.bf16.mxu0 %v5716_v15  ;;  %v5789_v15 = vld [vmem:[#allocation5 + $0x370] ss:$8 sps:$4 sm:$0xff]  }
 0x24e   : > { %3343 = vmatpush1.bf16.msra.mxu1 %v5720_v23  ;;  %3374 = vmatprep.mubr.bf16.mxu1 %v6658_v26 }
 0x24f   : > { %3344 = vmatprep.subr.bf16.mxu1 %v5725_v25 }
 0x250   : > { %2980 = vmatpush1.bf16.msra.mxu0 %v5714_v17  ;;  %v5794_v17 = vld [vmem:[#allocation5 + $0x384] ss:$8 sps:$4 sm:$0xff]  }
 0x251   : > { %2981 = vmatprep.subr.bf16.mxu0 %v5719_v0  ;;  %v5792_v0 = vld [vmem:[#allocation5 + $0x380] ss:$8 sps:$4 sm:$0xff]  }
 0x252   : > { %3345 = vmatpush1.bf16.msra.mxu1 %v5723_v27 }
 0x253   : > { %3346 = vmatprep.subr.bf16.mxu1 %v5728_v28 }
 0x254   : > { %2982 = vmatpush1.bf16.msra.mxu0 %v5717_v20  ;;  %v5795_v20 = vld [vmem:[#allocation5 + $0x390] ss:$8 sps:$4 sm:$0xff]  }
 0x255   : > { %3283 = vmatprep.subr.bf16.mxu0 %v5722_v21  ;;  %v5800_v21 = vld [vmem:[#allocation5 + $0x3a4] ss:$8 sps:$4 sm:$0xff]  }
 0x256   : > { %3347 = vmatpush1.bf16.msra.mxu1 %v5726_v29 }
 0x257   : > { %2984 = vmatmul.mubr.bf16.vlgmr.msra.gmra.mrb[16].mxu0 %v6634_v16  ;;  %3348 = vmatprep.subr.bf16.mxu1 %v5731_v30 }
 0x258   : > { %3284 = vmatpush1.bf16.msra.mxu0 %v5720_v23  ;;  %3315 = vmatprep.mubr.bf16.mxu0 %v6642_v31  ;;  %v5741_v31 = vld [vmem:[#allocation5 + $0x270] ss:$8 sps:$4 sm:$0xff]   ;;  %v5803_v23 = vld [vmem:[#allocation5 + $0x3b4] ss:$8 sps:$4 sm:$0xff]  }
 0x259   : > { %3285 = vmatprep.subr.bf16.mxu0 %v5725_v25  ;;  %v5806_v25 = vld [vmem:[#allocation5 + $0x3c4] ss:$8 sps:$4 sm:$0xff]  }
 0x25a   : > { %3349 = vmatpush1.bf16.msra.mxu1 %v5729_v32 }
 0x25b   : > { %3350 = vmatprep.subr.bf16.mxu1 %v5734_v33 }
 0x25c   : > { %3286 = vmatpush1.bf16.msra.mxu0 %v5723_v27  ;;  %v5809_v27 = vld [vmem:[#allocation5 + $0x3d4] ss:$8 sps:$4 sm:$0xff]  }
 0x25d   : > { %3287 = vmatprep.subr.bf16.mxu0 %v5728_v28  ;;  %v5807_v28 = vld [vmem:[#allocation5 + $0x3d0] ss:$8 sps:$4 sm:$0xff]  }
 0x25e   : > { %3351 = vmatpush1.bf16.msra.mxu1 %v5732_v34 }
 0x25f   : > { %3352 = vmatprep.subr.bf16.mxu1 %v5737_v35 }
 0x260   : > { %3288 = vmatpush1.bf16.msra.mxu0 %v5726_v29  ;;  %v5812_v29 = vld [vmem:[#allocation5 + $0x3e4] ss:$8 sps:$4 sm:$0xff]  }
 0x261   : > { %3289 = vmatprep.subr.bf16.mxu0 %v5731_v30  ;;  %v5810_v30 = vld [vmem:[#allocation5 + $0x3e0] ss:$8 sps:$4 sm:$0xff]  }
 0x262   : > { %3353 = vmatpush1.bf16.msra.mxu1 %v5735_v36 }
 0x263   : > { %3354 = vmatprep.subr.bf16.mxu1 %v5740_v38 }
 0x264   : > { %3290 = vmatpush1.bf16.msra.mxu0 %v5729_v32  ;;  %v5815_v32 = vld [vmem:[#allocation5 + $0x3f4] ss:$8 sps:$4 sm:$0xff]  }
 0x265   : > { %3291 = vmatprep.subr.bf16.mxu0 %v5734_v33  ;;  %v5813_v33 = vld [vmem:[#allocation5 + $0x3f0] ss:$8 sps:$4 sm:$0xff]  }
 0x266   : > { %3355 = vmatpush1.bf16.msra.mxu1 %v5738_v39 }
 0x267   : > { %3356 = vmatprep.subr.bf16.mxu1 %v5743_v40 }
 0x268   : > { %3292 = vmatpush1.bf16.msra.mxu0 %v5732_v34  ;;  %v5818_v34 = vld [vmem:[#allocation5 + $0x404] ss:$8 sps:$4 sm:$0xff]  }
 0x269   : > { %3293 = vmatprep.subr.bf16.mxu0 %v5737_v35  ;;  %v5816_v35 = vld [vmem:[#allocation5 + $0x400] ss:$8 sps:$4 sm:$0xff]  }
 0x26a   : > { %3357 = vmatpush1.bf16.msra.mxu1 %v5741_v31 }
 0x26b   : > { %3358 = vmatprep.subr.bf16.mxu1 %v5746_v41 }
 0x26c   : > { %3294 = vmatpush1.bf16.msra.mxu0 %v5735_v36  ;;  %v3623_v36 = vrot.slane %v6634_v16, 1  ;;  %v5870_v16 = vld [vmem:[%s6904_s5 + $0x18] sm:$0xff]  }
 0x26d   : > { %3295 = vmatprep.subr.bf16.mxu0 %v5740_v38  ;;  %v5821_v38 = vld [vmem:[#allocation5 + $0x414] ss:$8 sps:$4 sm:$0xff]  }
 0x26e   : > { %3359 = vmatpush1.bf16.msra.mxu1 %v5744_v42 }
 0x26f   : > { %3360 = vmatprep.subr.bf16.mxu1 %v5749_v43 }
 0x270   : > { %3296 = vmatpush1.bf16.msra.mxu0 %v5738_v39  ;;  %v3909_v39 = vrot.slane %v6648_v54, 1  ;;  %v5830_v54 = vld [vmem:[#allocation5 + $0x444] ss:$8 sps:$4 sm:$0xff]  }
 0x271   : > { %3297 = vmatprep.subr.bf16.mxu0 %v5743_v40  ;;  %v5819_v40 = vld [vmem:[#allocation5 + $0x410] ss:$8 sps:$4 sm:$0xff]  }
 0x272   : > { %3361 = vmatpush1.bf16.msra.mxu1 %v5747_v44 }
 0x273   : > { %3362 = vmatprep.subr.bf16.mxu1 %v5752_v45 }
 0x274   : > { %3298 = vmatpush1.bf16.msra.mxu0 %v5741_v31  ;;  %v5824_v31 = vld [vmem:[#allocation5 + $0x424] ss:$8 sps:$4 sm:$0xff]  }
 0x275   : > { %3299 = vmatprep.subr.bf16.mxu0 %v5746_v41  ;;  %v5822_v41 = vld [vmem:[#allocation5 + $0x420] ss:$8 sps:$4 sm:$0xff]  }
 0x276   : > { %3363 = vmatpush1.bf16.msra.mxu1 %v5750_v46 }
 0x277   : > { %3364 = vmatprep.subr.bf16.mxu1 %v5755_v47 }
 0x278   : > { %3300 = vmatpush1.bf16.msra.mxu0 %v5744_v42  ;;  %v5827_v42 = vld [vmem:[#allocation5 + $0x434] ss:$8 sps:$4 sm:$0xff]  }
 0x279   : > { %3301 = vmatprep.subr.bf16.mxu0 %v5749_v43  ;;  %v5825_v43 = vld [vmem:[#allocation5 + $0x430] ss:$8 sps:$4 sm:$0xff]  }
 0x27a   : > { %3365 = vmatpush1.bf16.msra.mxu1 %v5753_v48 }
 0x27b   : > { %3366 = vmatprep.subr.bf16.mxu1 %v5758_v49 }
 0x27c   : > { %3302 = vmatpush1.bf16.msra.mxu0 %v5747_v44  ;;  %v5828_v44 = vld [vmem:[#allocation5 + $0x440] ss:$8 sps:$4 sm:$0xff]  }
 0x27d   : > { %3303 = vmatprep.subr.bf16.mxu0 %v5752_v45  ;;  %v5833_v45 = vld [vmem:[#allocation5 + $0x454] ss:$8 sps:$4 sm:$0xff]  }
 0x27e   : > { %3367 = vmatpush1.bf16.msra.mxu1 %v5756_v50 }
 0x27f   : > { %3368 = vmatprep.subr.bf16.mxu1 %v5761_v51 }
 0x280   : > { %3304 = vmatpush1.bf16.msra.mxu0 %v5750_v46  ;;  %v5831_v46 = vld [vmem:[#allocation5 + $0x450] ss:$8 sps:$4 sm:$0xff]  }
 0x281   : > { %3305 = vmatprep.subr.bf16.mxu0 %v5755_v47  ;;  %v5836_v47 = vld [vmem:[#allocation5 + $0x464] ss:$8 sps:$4 sm:$0xff]  }
 0x282   : > { %3369 = vmatpush1.bf16.msra.mxu1 %v5759_v52 }
 0x283   : > { %3370 = vmatprep.subr.bf16.mxu1 %v5764_v53 }
 0x284   : > { %3306 = vmatpush1.bf16.msra.mxu0 %v5753_v48  ;;  %v5834_v48 = vld [vmem:[#allocation5 + $0x460] ss:$8 sps:$4 sm:$0xff]  }
 0x285   : > { %3307 = vmatprep.subr.bf16.mxu0 %v5758_v49  ;;  %v5839_v49 = vld [vmem:[#allocation5 + $0x474] ss:$8 sps:$4 sm:$0xff]  }
 0x286   : > { %3371 = vmatpush1.bf16.msra.mxu1 %v5762_v56 }
 0x287   : > { %3372 = vmatprep.subr.bf16.mxu1 %v5767_v57 }
 0x288   : > { %3308 = vmatpush1.bf16.msra.mxu0 %v5756_v50  ;;  %v5842_v50 = vld [vmem:[#allocation5 + $0x484] ss:$8 sps:$4 sm:$0xff]  }
 0x289   : > { %3309 = vmatprep.subr.bf16.mxu0 %v5761_v51  ;;  %v5840_v51 = vld [vmem:[#allocation5 + $0x480] ss:$8 sps:$4 sm:$0xff]  }
 0x28a   : > { %3373 = vmatpush1.bf16.msra.mxu1 %v5765_v59 }
 0x28b   : > { %3627 = vmatprep.subr.bf16.mxu1 %v5770_v61 }
 0x28c   : > { %3310 = vmatpush1.bf16.msra.mxu0 %v5759_v52  ;;  %v5845_v52 = vld [vmem:[#allocation5 + $0x494] ss:$8 sps:$4 sm:$0xff]  }
 0x28d   : > { %3375 = vmatmul.mubr.bf16.vlgmr.msra.gmra.mrb[16].mxu1 %v6666_v1  ;;  %3311 = vmatprep.subr.bf16.mxu0 %v5764_v53  ;;  %v5843_v53 = vld [vmem:[#allocation5 + $0x490] ss:$8 sps:$4 sm:$0xff]  }
 0x28e   : > { %3628 = vmatpush1.bf16.msra.mxu1 %v5768_v63  ;;  %3659 = vmatprep.mubr.bf16.mxu1 %v3624_v3 }
 0x28f   : > { %3629 = vmatprep.subr.bf16.mxu1 %v5773_v2 }
 0x290   : > { %3312 = vmatpush1.bf16.msra.mxu0 %v5762_v56  ;;  %v5848_v56 = vld [vmem:[#allocation5 + $0x4a4] ss:$8 sps:$4 sm:$0xff]  }
 0x291   : > { %3313 = vmatprep.subr.bf16.mxu0 %v5767_v57  ;;  %v5846_v57 = vld [vmem:[#allocation5 + $0x4a0] ss:$8 sps:$4 sm:$0xff]  }
 0x292   : > { %3630 = vmatpush1.bf16.msra.mxu1 %v5771_v4 }
 0x293   : > { %3631 = vmatprep.subr.bf16.mxu1 %v5776_v5 }
 0x294   : > { %3314 = vmatpush1.bf16.msra.mxu0 %v5765_v59  ;;  %v5849_v59 = vld [vmem:[#allocation5 + $0x4b0] ss:$8 sps:$4 sm:$0xff]  }
 0x295   : > { %3578 = vmatprep.subr.bf16.mxu0 %v5770_v61  ;;  %v5852_v61 = vld [vmem:[#allocation5 + $0x4c0] ss:$8 sps:$4 sm:$0xff]  }
 0x296   : > { %3632 = vmatpush1.bf16.msra.mxu1 %v5774_v6 }
 0x297   : > { %3316 = vmatmul.mubr.bf16.vlgmr.msra.gmra.mrb[16].mxu0 %v6644_v37  ;;  %3633 = vmatprep.subr.bf16.mxu1 %v5779_v7  ;;  %v5786_v37 = vld [vmem:[#allocation5 + $0x360] ss:$8 sps:$4 sm:$0xff]  }
 0x298   : > { %3579 = vmatpush1.bf16.msra.mxu0 %v5768_v63  ;;  %3610 = vmatprep.mubr.bf16.mxu0 %v6658_v26  ;;  %v5804_v26 = vld [vmem:[#allocation5 + $0x3c0] ss:$8 sps:$4 sm:$0xff]   ;;  %v5855_v63 = vld [vmem:[#allocation5 + $0x4d0] ss:$8 sps:$4 sm:$0xff]  }
 0x299   : > { %3580 = vmatprep.subr.bf16.mxu0 %v5773_v2  ;;  %v5858_v2 = vld [vmem:[#allocation5 + $0x4e0] ss:$8 sps:$4 sm:$0xff]  }
 0x29a   : > { %3634 = vmatpush1.bf16.msra.mxu1 %v5777_v8 }
 0x29b   : > { %3635 = vmatprep.subr.bf16.mxu1 %v5782_v9 }
 0x29c   : > { %3581 = vmatpush1.bf16.msra.mxu0 %v5771_v4  ;;  %v5861_v4 = vld [vmem:[#allocation5 + $0x4f0] ss:$8 sps:$4 sm:$0xff]  }
 0x29d   : > { %3582 = vmatprep.subr.bf16.mxu0 %v5776_v5  ;;  %v5864_v5 = vld [vmem:[%s6904_s5] sm:$0xff]  }
 0x29e   : > { %3636 = vmatpush1.bf16.msra.mxu1 %v5780_v10 }
 0x29f   : > { %3637 = vmatprep.subr.bf16.mxu1 %v5785_v11 }
 0x2a0   : > { %3583 = vmatpush1.bf16.msra.mxu0 %v5774_v6  ;;  %v3908_v6 = vrot.slane %v6650_v55, 1  ;;  %v5868_v55 = vld [vmem:[%s6904_s5 + $0x10] sm:$0xff]  }
 0x2a1   : > { %3584 = vmatprep.subr.bf16.mxu0 %v5779_v7  ;;  %v6111_v7 = vmov 0.0  }
 0x2a2   : > { %3638 = vmatpush1.bf16.msra.mxu1 %v5783_v12 }
 0x2a3   : > { %3639 = vmatprep.subr.bf16.mxu1 %v5788_v13 }
 0x2a4   : > { %3585 = vmatpush1.bf16.msra.mxu0 %v5777_v8  ;;  %v5866_v8 = vld [vmem:[%s6904_s5 + $0x8] sm:$0xff]  }
 0x2a5   : > { %3586 = vmatprep.subr.bf16.mxu0 %v5782_v9  ;;  %v5865_v9 = vld [vmem:[%s6904_s5 + $0x40] sm:$0xff]  }
 0x2a6   : > { %3640 = vmatpush1.bf16.msra.mxu1 %v5786_v37 }
 0x2a7   : > { %3641 = vmatprep.subr.bf16.mxu1 %v5791_v14 }
 0x2a8   : > { %3587 = vmatpush1.bf16.msra.mxu0 %v5780_v10  ;;  %v5867_v10 = vld [vmem:[%s6904_s5 + $0x48] sm:$0xff]  }
 0x2a9   : > { %3588 = vmatprep.subr.bf16.mxu0 %v5785_v11  ;;  %v5869_v11 = vld [vmem:[%s6904_s5 + $0x50] sm:$0xff]  }
 0x2aa   : > { %3642 = vmatpush1.bf16.msra.mxu1 %v5789_v15 }
 0x2ab   : > { %3643 = vmatprep.subr.bf16.mxu1 %v5794_v17 }
 0x2ac   : > { %3589 = vmatpush1.bf16.msra.mxu0 %v5783_v12  ;;  %v5871_v12 = vld [vmem:[%s6904_s5 + $0x58] sm:$0xff]  }
 0x2ad   : > { %3590 = vmatprep.subr.bf16.mxu0 %v5788_v13  ;;  %v5872_v13 = vld [vmem:[%s6904_s5 + $0x20] sm:$0xff]  }
 0x2ae   : > { %3644 = vmatpush1.bf16.msra.mxu1 %v5792_v0 }
 0x2af   : > { %3645 = vmatprep.subr.bf16.mxu1 %v5797_v19 }
 0x2b0   : > { %3591 = vmatpush1.bf16.msra.mxu0 %v5786_v37  ;;  %v5873_v37 = vld [vmem:[%s6904_s5 + $0x60] sm:$0xff]  }
 0x2b1   : > { %3592 = vmatprep.subr.bf16.mxu0 %v5791_v14  ;;  %v5874_v14 = vld [vmem:[%s6904_s5 + $0x28] sm:$0xff]  }
 0x2b2   : > { %3646 = vmatpush1.bf16.msra.mxu1 %v5795_v20 }
 0x2b3   : > { %3647 = vmatprep.subr.bf16.mxu1 %v5800_v21 }
 0x2b4   : > { %3593 = vmatpush1.bf16.msra.mxu0 %v5789_v15  ;;  %v5875_v15 = vld [vmem:[%s6904_s5 + $0x68] sm:$0xff]  }
 0x2b5   : > { %3594 = vmatprep.subr.bf16.mxu0 %v5794_v17  ;;  %v5876_v17 = vld [vmem:[%s6904_s5 + $0x30] sm:$0xff]  }
 0x2b6   : > { %3648 = vmatpush1.bf16.msra.mxu1 %v5798_v22 }
 0x2b7   : > { %3649 = vmatprep.subr.bf16.mxu1 %v5803_v23 }
 0x2b8   : > { %3595 = vmatpush1.bf16.msra.mxu0 %v5792_v0  ;;  %v5877_v0 = vld [vmem:[%s6904_s5 + $0x70] sm:$0xff]  }
 0x2b9   : > { %3596 = vmatprep.subr.bf16.mxu0 %v5797_v19  ;;  %v5878_v19 = vld [vmem:[%s6904_s5 + $0x38] sm:$0xff]  }
 0x2ba   : > { %3650 = vmatpush1.bf16.msra.mxu1 %v5801_v24 }
 0x2bb   : > { %3651 = vmatprep.subr.bf16.mxu1 %v5806_v25 }
 0x2bc   : > { %3597 = vmatpush1.bf16.msra.mxu0 %v5795_v20  ;;  %v5879_v20 = vld [vmem:[%s6904_s5 + $0x78] sm:$0xff]  }
 0x2bd   : > { %3598 = vmatprep.subr.bf16.mxu0 %v5800_v21 }
 0x2be   : > { %3652 = vmatpush1.bf16.msra.mxu1 %v5804_v26 }
 0x2bf   : > { %3653 = vmatprep.subr.bf16.mxu1 %v5809_v27 }
 0x2c0   : > { %3599 = vmatpush1.bf16.msra.mxu0 %v5798_v22 }
 0x2c1   : > { %3600 = vmatprep.subr.bf16.mxu0 %v5803_v23 }
 0x2c2   : > { %3654 = vmatpush1.bf16.msra.mxu1 %v5807_v28 }
 0x2c3   : > { %3655 = vmatprep.subr.bf16.mxu1 %v5812_v29 }
 0x2c4   : > { %3601 = vmatpush1.bf16.msra.mxu0 %v5801_v24 }
 0x2c5   : > { %3602 = vmatprep.subr.bf16.mxu0 %v5806_v25 }
 0x2c6   : > { %3656 = vmatpush1.bf16.msra.mxu1 %v5810_v30 }
 0x2c7   : > { %3657 = vmatprep.subr.bf16.mxu1 %v5815_v32 }
 0x2c8   : > { %3603 = vmatpush1.bf16.msra.mxu0 %v5804_v26 }
 0x2c9   : > { %3604 = vmatprep.subr.bf16.mxu0 %v5809_v27 }
 0x2ca   : > { %3658 = vmatpush1.bf16.msra.mxu1 %v5813_v33 }
 0x2cb   : > { %3912 = vmatprep.subr.bf16.mxu1 %v5818_v34 }
 0x2cc   : > { %3605 = vmatpush1.bf16.msra.mxu0 %v5807_v28 }
 0x2cd   : > { %3660 = vmatmul.mubr.bf16.vlgmr.msra.gmra.mrb[16].mxu1 %v3623_v36  ;;  %3606 = vmatprep.subr.bf16.mxu0 %v5812_v29 }
 0x2ce   : > { %3913 = vmatpush1.bf16.msra.mxu1 %v5816_v35  ;;  %3944 = vmatprep.mubr.bf16.mxu1 %v3909_v39 }
 0x2cf   : > { %3914 = vmatprep.subr.bf16.mxu1 %v5821_v38 }
 0x2d0   : > { %3607 = vmatpush1.bf16.msra.mxu0 %v5810_v30  ;;  %v5026_v30 = vld [vmem:[%s6903_s4] ss:$0 sm:$0xff] }
 0x2d1   : > { %3608 = vmatprep.subr.bf16.mxu0 %v5815_v32 }
 0x2d2   : > { %3915 = vmatpush1.bf16.msra.mxu1 %v5819_v40 }
 0x2d3   : > { %3916 = vmatprep.subr.bf16.mxu1 %v5824_v31 }
 0x2d4   : > { %3609 = vmatpush1.bf16.msra.mxu0 %v5813_v33 }
 0x2d5   : > { %3863 = vmatprep.subr.bf16.mxu0 %v5818_v34 }
 0x2d6   : > { %3917 = vmatpush1.bf16.msra.mxu1 %v5822_v41 }
 0x2d7   : > { %3611 = vmatmul.mubr.bf16.vlgmr.msra.gmra.mrb[16].mxu0 %v6666_v1  ;;  %3918 = vmatprep.subr.bf16.mxu1 %v5827_v42  ;;  %v5860_v1 = vld [vmem:[#allocation5 + $0x4e4] ss:$8 sps:$4 sm:$0xff]  }
 0x2d8   : > { %3864 = vmatpush1.bf16.msra.mxu0 %v5816_v35  ;;  %3895 = vmatprep.mubr.bf16.mxu0 %v3624_v3  ;;  %v5863_v3 = vld [vmem:[#allocation5 + $0x4f4] ss:$8 sps:$4 sm:$0xff]  }
 0x2d9   : > { %3865 = vmatprep.subr.bf16.mxu0 %v5821_v38  ;;  %v5880_v38 = vld [vmem:[%s6904_s5 + $0x80] sm:$0xff]  }
 0x2da   : > { %3919 = vmatpush1.bf16.msra.mxu1 %v5825_v43 }
 0x2db   : > { %3920 = vmatprep.subr.bf16.mxu1 %v5830_v54 }
 0x2dc   : > { %3866 = vmatpush1.bf16.msra.mxu0 %v5819_v40  ;;  %v5881_v40 = vld [vmem:[%s6904_s5 + $0x88] sm:$0xff]  }
 0x2dd   : > { %3867 = vmatprep.subr.bf16.mxu0 %v5824_v31  ;;  %v5882_v31 = vld [vmem:[%s6904_s5 + $0x90] sm:$0xff]  }
 0x2de   : > { %3921 = vmatpush1.bf16.msra.mxu1 %v5828_v44 }
 0x2df   : > { %3922 = vmatprep.subr.bf16.mxu1 %v5833_v45 }
 0x2e0   : > { %3868 = vmatpush1.bf16.msra.mxu0 %v5822_v41  ;;  %v5883_v41 = vld [vmem:[%s6904_s5 + $0x98] sm:$0xff]  }
 0x2e1   : > { %3869 = vmatprep.subr.bf16.mxu0 %v5827_v42  ;;  %v5884_v42 = vld [vmem:[%s6904_s5 + $0xa0] sm:$0xff]  }
 0x2e2   : > { %3923 = vmatpush1.bf16.msra.mxu1 %v5831_v46 }
 0x2e3   : > { %3924 = vmatprep.subr.bf16.mxu1 %v5836_v47 }
 0x2e4   : > { %3870 = vmatpush1.bf16.msra.mxu0 %v5825_v43  ;;  %v5885_v43 = vld [vmem:[%s6904_s5 + $0xa8] sm:$0xff]  }
 0x2e5   : > { %3871 = vmatprep.subr.bf16.mxu0 %v5830_v54  ;;  %v5886_v54 = vld [vmem:[%s6904_s5 + $0xb0] sm:$0xff]  }
 0x2e6   : > { %3925 = vmatpush1.bf16.msra.mxu1 %v5834_v48 }
 0x2e7   : > { %3926 = vmatprep.subr.bf16.mxu1 %v5839_v49 }
 0x2e8   : > { %3872 = vmatpush1.bf16.msra.mxu0 %v5828_v44  ;;  %v5887_v44 = vld [vmem:[%s6904_s5 + $0xb8] sm:$0xff]  }
 0x2e9   : > { %3873 = vmatprep.subr.bf16.mxu0 %v5833_v45  ;;  %v5888_v45 = vld [vmem:[%s6904_s5 + $0xc0] sm:$0xff]  }
 0x2ea   : > { %3927 = vmatpush1.bf16.msra.mxu1 %v5837_v18 }
 0x2eb   : > { %3928 = vmatprep.subr.bf16.mxu1 %v5842_v50 }
 0x2ec   : > { %3874 = vmatpush1.bf16.msra.mxu0 %v5831_v46 }
 0x2ed   : > { %3875 = vmatprep.subr.bf16.mxu0 %v5836_v47  ;;  %v5889_v47 = vld [vmem:[%s6904_s5 + $0xc8] sm:$0xff]  }
 0x2ee   : > { %3929 = vmatpush1.bf16.msra.mxu1 %v5840_v51 }
 0x2ef   : > { %3930 = vmatprep.subr.bf16.mxu1 %v5845_v52 }
 0x2f0   : > { %3876 = vmatpush1.bf16.msra.mxu0 %v5834_v48  ;;  %v5890_v48 = vld [vmem:[%s6904_s5 + $0xd0] sm:$0xff]  }
 0x2f1   : > { %3877 = vmatprep.subr.bf16.mxu0 %v5839_v49  ;;  %v5891_v49 = vld [vmem:[%s6904_s5 + $0xd8] sm:$0xff]  }
 0x2f2   : > { %3931 = vmatpush1.bf16.msra.mxu1 %v5843_v53 }
 0x2f3   : > { %3932 = vmatprep.subr.bf16.mxu1 %v5848_v56 }
 0x2f4   : > { %3878 = vmatpush1.bf16.msra.mxu0 %v5837_v18  ;;  %v5892_v18 = vld [vmem:[%s6904_s5 + $0xe0] sm:$0xff]  }
 0x2f5   : > { %3879 = vmatprep.subr.bf16.mxu0 %v5842_v50  ;;  %v5893_v50 = vld [vmem:[%s6904_s5 + $0xe8] sm:$0xff]  }
 0x2f6   : > { %3933 = vmatpush1.bf16.msra.mxu1 %v5846_v57 }
 0x2f7   : > { %3934 = vmatprep.subr.bf16.mxu1 %v5851_v58 }
 0x2f8   : > { %3880 = vmatpush1.bf16.msra.mxu0 %v5840_v51  ;;  %v5894_v51 = vld [vmem:[%s6904_s5 + $0xf0] sm:$0xff]  }
 0x2f9   : > { %3881 = vmatprep.subr.bf16.mxu0 %v5845_v52  ;;  %v5895_v52 = vld [vmem:[%s6904_s5 + $0xf8] sm:$0xff]  }
 0x2fa   : > { %3935 = vmatpush1.bf16.msra.mxu1 %v5849_v59 }
 0x2fb   : > { %3936 = vmatprep.subr.bf16.mxu1 %v5854_v60 }
 0x2fc   : > { %3882 = vmatpush1.bf16.msra.mxu0 %v5843_v53 }
 0x2fd   : > { %3883 = vmatprep.subr.bf16.mxu0 %v5848_v56  ;;  %v5896_v56 = vld [vmem:[#allocation7] sm:$0xff]  }
 0x2fe   : > { %3937 = vmatpush1.bf16.msra.mxu1 %v5852_v61 }
 0x2ff   : > { %3938 = vmatprep.subr.bf16.mxu1 %v5857_v62 }
 0x300   : > { %3884 = vmatpush1.bf16.msra.mxu0 %v5846_v57  ;;  %v5897_v57 = vld [vmem:[#allocation7 + $0x8] sm:$0xff]  }
 0x301   : > { %3885 = vmatprep.subr.bf16.mxu0 %v5851_v58  ;;  %v5898_v58 = vld [vmem:[#allocation7 + $0x10] sm:$0xff]  }
 0x302   : > { %3939 = vmatpush1.bf16.msra.mxu1 %v5855_v63 }
 0x303   : > { %3940 = vmatprep.subr.bf16.mxu1 %v5860_v1 }
 0x304   : > { %3886 = vmatpush1.bf16.msra.mxu0 %v5849_v59  ;;  %v5899_v59 = vld [vmem:[#allocation7 + $0x18] sm:$0xff]  }
 0x305   : > { %3887 = vmatprep.subr.bf16.mxu0 %v5854_v60  ;;  %v5900_v60 = vld [vmem:[#allocation7 + $0x20] sm:$0xff]  }
 0x306   : > { %3941 = vmatpush1.bf16.msra.mxu1 %v5858_v2 }
 0x307   : > { %3942 = vmatprep.subr.bf16.mxu1 %v5863_v3 }
 0x308   : > { %3888 = vmatpush1.bf16.msra.mxu0 %v5852_v61  ;;  %v5901_v61 = vld [vmem:[#allocation7 + $0x28] sm:$0xff]  }
 0x309   : > { %3889 = vmatprep.subr.bf16.mxu0 %v5857_v62  ;;  %v5902_v62 = vld [vmem:[#allocation7 + $0x30] sm:$0xff]  }
 0x30a   : > { %3943 = vmatpush1.bf16.msra.mxu1 %v5861_v4 }
 0x30b   : > { %5181 = vmatprep.subr.bf16.mxu1 %v6111_v7 }
 0x30c   : > { %3890 = vmatpush1.bf16.msra.mxu0 %v5855_v63  ;;  %v5903_v63 = vld [vmem:[#allocation7 + $0x38] sm:$0xff]  }
 0x30d   : > { %3945 = vmatmul.mubr.bf16.vlgmr.msra.gmra.mrb[16].mxu1 %v3908_v6  ;;  %3891 = vmatprep.subr.bf16.mxu0 %v5860_v1 }
 0x30e   : > { %5182 = vmatpush3.bf16.msra.mxu1 %v5864_v5  ;;  %5197 = vmatprep.mubr.msk.bf16.mxu1 %vm6112_vm2, %v6111_v7  ;;  %v3968_v5 = vld [vmem:[%s6905_s6] sm:$0x1] }
 0x30f   : > { %5183 = vmatprep.subr.bf16.mxu1 %v6111_v7 }
 0x310   : > { %3892 = vmatpush1.bf16.msra.mxu0 %v5858_v2 }
 0x311   : > { %3893 = vmatprep.subr.bf16.mxu0 %v5863_v3 }
 0x312   : > { %5184 = vmatpush3.bf16.msra.mxu1 %v5866_v8 }
 0x313   : > { %5185 = vmatprep.subr.bf16.mxu1 %v6111_v7 }
 0x314   : > { %3894 = vmatpush1.bf16.msra.mxu0 %v5861_v4 }
 0x315   : > { %5201 = vmatprep.subr.bf16.mxu0 %v6111_v7 }
 0x316   : > { %5186 = vmatpush3.bf16.msra.mxu1 %v5868_v55 }
 0x317   : > { %3896 = vmatmul.mubr.bf16.vlgmr.msra.gmra.mrb[16].mxu0 %v3623_v36  ;;  %5187 = vmatprep.subr.bf16.mxu1 %v6111_v7 }
 0x318   : > { %5202 = vmatpush3.bf16.msra.mxu0 %v5865_v9  ;;  %5217 = vmatprep.mubr.msk.bf16.mxu0 %vm6112_vm2, %v6111_v7 }
 0x319   : > { %5203 = vmatprep.subr.bf16.mxu0 %v6111_v7 }
 0x31a   : > { %5188 = vmatpush3.bf16.msra.mxu1 %v5870_v16 }
 0x31b   : > { %5189 = vmatprep.subr.bf16.mxu1 %v6111_v7 }
 0x31c   : > { %5204 = vmatpush3.bf16.msra.mxu0 %v5867_v10 }
 0x31d   : > { %5205 = vmatprep.subr.bf16.mxu0 %v6111_v7 }
 0x31e   : > { %5190 = vmatpush3.bf16.msra.mxu1 %v5872_v13 }
 0x31f   : > { %5191 = vmatprep.subr.bf16.mxu1 %v6111_v7 }
 0x320   : > { %5206 = vmatpush3.bf16.msra.mxu0 %v5869_v11 }
 0x321   : > { %5207 = vmatprep.subr.bf16.mxu0 %v6111_v7 }
 0x322   : > { %5192 = vmatpush3.bf16.msra.mxu1 %v5874_v14  ;;  %v5906_v14 = vld [vmem:[#allocation8 + $0x10] sm:$0xff]  }
 0x323   : > { %5193 = vmatprep.subr.bf16.mxu1 %v6111_v7 }
 0x324   : > { %5208 = vmatpush3.bf16.msra.mxu0 %v5871_v12  ;;  %v5904_v12 = vld [vmem:[#allocation8] sm:$0xff]  }
 0x325   : > { %5209 = vmatprep.subr.bf16.mxu0 %v6111_v7 }
 0x326   : > { %5194 = vmatpush3.bf16.msra.mxu1 %v5876_v17  ;;  %v5908_v17 = vld [vmem:[#allocation8 + $0x20] sm:$0xff]  }
 0x327   : > { %5195 = vmatprep.subr.bf16.mxu1 %v6111_v7 }
 0x328   : > { %5210 = vmatpush3.bf16.msra.mxu0 %v5873_v37  ;;  %v5905_v37 = vld [vmem:[#allocation8 + $0x8] sm:$0xff]  }
 0x329   : > { %5211 = vmatprep.subr.bf16.mxu0 %v6111_v7 }
 0x32a   : > { %5196 = vmatpush3.bf16.msra.mxu1 %v5878_v19  ;;  %v5910_v19 = vld [vmem:[#allocation8 + $0x30] sm:$0xff]  }
 0x32b   : > { %5261 = vmatprep.subr.bf16.mxu1 %v6111_v7 }
 0x32c   : > { %5212 = vmatpush3.bf16.msra.mxu0 %v5875_v15  ;;  %v5907_v15 = vld [vmem:[#allocation8 + $0x18] sm:$0xff]  }
 0x32d   : > { %5213 = vmatprep.subr.bf16.mxu0 %v6111_v7 }
 0x330   : > { %5214 = vmatpush3.bf16.msra.mxu0 %v5877_v0  ;;  %v5909_v0 = vld [vmem:[#allocation8 + $0x28] sm:$0xff]  }
 0x331   : > { %5215 = vmatprep.subr.bf16.mxu0 %v6111_v7 }
 0x334   : > { %5216 = vmatpush3.bf16.msra.mxu0 %v5879_v20  ;;  %v5911_v20 = vld [vmem:[#allocation8 + $0x38] sm:$0xff]  }
 0x335   : > { %5221 = vmatprep.subr.bf16.mxu0 %v6111_v7 }
 0x3e0   : > { %v3946_v21 = vpop.f32.mrb[16].mxu1 }
 0x3e1   : > { %v3948_v22 = vpop.f32.mrb[17].mxu1 }
 0x3e2   : > { %v3950_v23 = vpop.f32.mrb[18].mxu1 }
 0x3e3   : > { %v3951_v24 = vpop.f32.mrb[19].mxu1 }
 0x3ea   : > { %v3897_v25 = vpop.f32.mrb[16].mxu0 }
 0x3eb   : > { %v3955_v26 = vmax.f32 %v3897_v25, %v3946_v21  ;;  %v3899_v27 = vpop.f32.mrb[17].mxu0  ;;  %v4419_v21 = vld [vmem:[%s6907_s8] sm:$0x1] }
 0x3ec   : > { %v3956_v28 = vmax.f32 %v3899_v27, %v3948_v22  ;;  %v3901_v29 = vpop.f32.mrb[18].mxu0 }
 0x3ed   : > { %v3902_v32 = vpop.f32.mrb[19].mxu0 }
 0x3ee   : > { %v3957_v33 = vmax.f32 %v3955_v26, %v3956_v28 }
 0x3f0   : > { %v3965_v34 = vadd.f32 %v5026_v30, %v3957_v33 }
 0x3f2   : > { %v3966_v35 = vmax.f32 %v3965_v34, 0.0 }
 0x3f4   : > { %v3967_v36 = vpack.c.bf16 %v3966_v35, %v3966_v35 }
 0x3f6   : > { %5198 = vmatmul.mubr.bf16.vlgmr.msra.gmra.mrb[20].mxu1 %v3967_v36  ;;  %v4092_v39 = vshrl.u32 %v3967_v36, 16  ;;  %v4202_v46 = vrot.slane %v3967_v36, 1 }
 0x3f7   : > { %5277 = vmatprep.mubr.msk.bf16.mxu1 %vm6112_vm2, %v6111_v7  ;;  %5262 = vmatpush3.bf16.msra.mxu1 %v5896_v56 }
 0x3f8   : > { %5218 = vmatmul.mubr.bf16.vlgmr.msra.gmra.mrb[20].mxu0 %v4092_v39  ;;  %v4310_v53 = vrot.slane %v4092_v39, 1  ;;  %5263 = vmatprep.subr.bf16.mxu1 %v6111_v7 }
 0x3f9   : > { %5222 = vmatpush3.bf16.msra.mxu0 %v5880_v38  ;;  %5237 = vmatprep.mubr.msk.bf16.mxu0 %vm6112_vm2, %v6111_v7 }
 0x3fa   : > { %5223 = vmatprep.subr.bf16.mxu0 %v6111_v7 }
 0x3fb   : > { %5264 = vmatpush3.bf16.msra.mxu1 %v5897_v57 }
 0x3fc   : > { %5265 = vmatprep.subr.bf16.mxu1 %v6111_v7 }
 0x3fd   : > { %5224 = vmatpush3.bf16.msra.mxu0 %v5881_v40 }
 0x3fe   : > { %5225 = vmatprep.subr.bf16.mxu0 %v6111_v7 }
 0x3ff   : > { %5266 = vmatpush3.bf16.msra.mxu1 %v5898_v58 }
 0x400   : > { %5267 = vmatprep.subr.bf16.mxu1 %v6111_v7 }
 0x401   : > { %5226 = vmatpush3.bf16.msra.mxu0 %v5882_v31 }
 0x402   : > { %5227 = vmatprep.subr.bf16.mxu0 %v6111_v7 }
 0x403   : > { %5268 = vmatpush3.bf16.msra.mxu1 %v5899_v59 }
 0x404   : > { %5269 = vmatprep.subr.bf16.mxu1 %v6111_v7 }
 0x405   : > { %5228 = vmatpush3.bf16.msra.mxu0 %v5883_v41 }
 0x406   : > { %5229 = vmatprep.subr.bf16.mxu0 %v6111_v7 }
 0x407   : > { %5270 = vmatpush3.bf16.msra.mxu1 %v5900_v60 }
 0x408   : > { %5271 = vmatprep.subr.bf16.mxu1 %v6111_v7 }
 0x409   : > { %5230 = vmatpush3.bf16.msra.mxu0 %v5884_v42 }
 0x40a   : > { %5231 = vmatprep.subr.bf16.mxu0 %v6111_v7 }
 0x40b   : > { %5272 = vmatpush3.bf16.msra.mxu1 %v5901_v61 }
 0x40c   : > { %5273 = vmatprep.subr.bf16.mxu1 %v6111_v7 }
 0x40d   : > { %5232 = vmatpush3.bf16.msra.mxu0 %v5885_v43 }
 0x40e   : > { %5233 = vmatprep.subr.bf16.mxu0 %v6111_v7 }
 0x40f   : > { %5274 = vmatpush3.bf16.msra.mxu1 %v5902_v62 }
 0x410   : > { %5275 = vmatprep.subr.bf16.mxu1 %v6111_v7 }
 0x411   : > { %5234 = vmatpush3.bf16.msra.mxu0 %v5886_v54 }
 0x412   : > { %5235 = vmatprep.subr.bf16.mxu0 %v6111_v7 }
 0x413   : > { %5276 = vmatpush3.bf16.msra.mxu1 %v5903_v63 }
 0x414   : > { %5281 = vmatprep.subr.bf16.mxu1 %v6111_v7 }
 0x415   : > { %5236 = vmatpush3.bf16.msra.mxu0 %v5887_v44 }
 0x416   : > { %5241 = vmatprep.subr.bf16.mxu0 %v6111_v7 }
 0x418   : > { %5238 = vmatmul.mubr.bf16.vlgmr.msra.gmra.mrb[20].mxu0 %v4202_v46 }
 0x419   : > { %5242 = vmatpush3.bf16.msra.mxu0 %v5888_v45  ;;  %5257 = vmatprep.mubr.msk.bf16.mxu0 %vm6112_vm2, %v6111_v7 }
 0x41a   : > { %5243 = vmatprep.subr.bf16.mxu0 %v6111_v7 }
 0x41d   : > { %5244 = vmatpush3.bf16.msra.mxu0 %v5889_v47 }
 0x41e   : > { %5245 = vmatprep.subr.bf16.mxu0 %v6111_v7 }
 0x421   : > { %5246 = vmatpush3.bf16.msra.mxu0 %v5890_v48 }
 0x422   : > { %5247 = vmatprep.subr.bf16.mxu0 %v6111_v7 }
 0x425   : > { %5248 = vmatpush3.bf16.msra.mxu0 %v5891_v49 }
 0x426   : > { %5249 = vmatprep.subr.bf16.mxu0 %v6111_v7 }
 0x429   : > { %5250 = vmatpush3.bf16.msra.mxu0 %v5892_v18 }
 0x42a   : > { %5251 = vmatprep.subr.bf16.mxu0 %v6111_v7 }
 0x42d   : > { %5252 = vmatpush3.bf16.msra.mxu0 %v5893_v50 }
 0x42e   : > { %5253 = vmatprep.subr.bf16.mxu0 %v6111_v7 }
 0x431   : > { %5254 = vmatpush3.bf16.msra.mxu0 %v5894_v51 }
 0x432   : > { %5255 = vmatprep.subr.bf16.mxu0 %v6111_v7 }
 0x435   : > { %5256 = vmatpush3.bf16.msra.mxu0 %v5895_v52 }
 0x438   : > { %5258 = vmatmul.mubr.bf16.vlgmr.msra.gmra.mrb[20].mxu0 %v4310_v53 }
 0x4c9   : > { %v4067_v1 = vpop.f32.mrb[20].mxu1 }
 0x4ca   : > { %v5199_v2 = vpop.f32.mrb[21].mxu1  ;;  %v4073_v6 = vadd.f32 %v4067_v1, %v3968_v5 }
 0x4cb   : > { %v4070_v3 = vpop.f32.mrb[22].mxu1 }
 0x4cc   : > { %v5200_v4 = vpop.f32.mrb[23].mxu1 }
 0x50b   : > { %v4394_v8 = vpop.f32.mrb[20].mxu0 }
 0x50c   : > { %v5302_v55 = vadd.f32 %v4394_v8, %v4073_v6  ;;  %v5259_v9 = vpop.f32.mrb[21].mxu0 }
 0x50d   : > { %v4397_v10 = vpop.f32.mrb[22].mxu0 }
 0x50e   : > { %v4401_v11 = vmax.f32 %v5302_v55, 0.0  ;;  %v5260_v16 = vpop.f32.mrb[23].mxu0 }
 0x510   : > { %v4402_v13 = vpack.c.bf16 %v4401_v11, %v4401_v11 }
 0x512   : > { %5278 = vmatmul.mubr.bf16.vlgmr.msra.gmra.mrb[24].mxu1 %v4402_v13 }
 0x513   : > { %5282 = vmatpush3.bf16.msra.mxu1 %v5904_v12  ;;  %5297 = vmatprep.mubr.msk.bf16.mxu1 %vm6112_vm2, %v6111_v7 }
 0x514   : > { %5283 = vmatprep.subr.bf16.mxu1 %v6111_v7 }
 0x517   : > { %5284 = vmatpush3.bf16.msra.mxu1 %v5905_v37 }
 0x518   : > { %5285 = vmatprep.subr.bf16.mxu1 %v6111_v7 }
 0x51b   : > { %5286 = vmatpush3.bf16.msra.mxu1 %v5906_v14 }
 0x51c   : > { %5287 = vmatprep.subr.bf16.mxu1 %v6111_v7 }
 0x51f   : > { %5288 = vmatpush3.bf16.msra.mxu1 %v5907_v15 }
 0x520   : > { %5289 = vmatprep.subr.bf16.mxu1 %v6111_v7 }
 0x523   : > { %5290 = vmatpush3.bf16.msra.mxu1 %v5908_v17 }
 0x524   : > { %5291 = vmatprep.subr.bf16.mxu1 %v6111_v7 }
 0x527   : > { %5292 = vmatpush3.bf16.msra.mxu1 %v5909_v0 }
 0x528   : > { %5293 = vmatprep.subr.bf16.mxu1 %v6111_v7 }
 0x52b   : > { %5294 = vmatpush3.bf16.msra.mxu1 %v5910_v19 }
 0x52c   : > { %5295 = vmatprep.subr.bf16.mxu1 %v6111_v7  ;;  %v4526_v7 = vld [vmem:[%s6909_s10] sm:$0x1] }
 0x52f   : > { %5296 = vmatpush3.bf16.msra.mxu1 %v5911_v20 }
 0x5e5   : > { %v4502_v22 = vpop.f32.mrb[24].mxu1 }
 0x5e6   : > { %v4503_v23 = vadd.f32 %v4502_v22, %v4419_v21  ;;  %v5279_v24 = vpop.f32.mrb[25].mxu1 }
 0x5e7   : > { %v4505_v25 = vpop.f32.mrb[26].mxu1 }
 0x5e8   : > { %v4508_v26 = vmax.f32 %v4503_v23, 0.0  ;;  %v5280_v27 = vpop.f32.mrb[27].mxu1 }
 0x5ea   : > { %v4509_v28 = vpack.c.bf16 %v4508_v26, %v4508_v26 }
 0x5ec   : > { %5298 = vmatmul.mubr.bf16.vlgmr.msra.gmra.mrb[28].mxu1 %v4509_v28 }
 0x6bf   : > { %v4609_v29 = vpop.f32.mrb[28].mxu1 }
 0x6c0   : > { %v4610_v30 = vadd.f32 %v4609_v29, %v4526_v7  ;;  %v5299_v32 = vpop.f32.mrb[29].mxu1 }
 0x6c1   : > { %v4612_v33 = vpop.f32.mrb[30].mxu1 }
 0x6c2   : > { %4615 = vst [vmem:[%s437_s15] sm:$0x1] %v4610_v30  ;;  %v5300_v34 = vpop.f32.mrb[31].mxu1 }
 0x6c3   : > { %6037 = shalt.err (!%p6034_p5)
}
 0x6c4   : > { %s6038_s28 = scalar_lea.hbm %s6857_s29, 16  ;;  %s6042_s24 = scalar_lea.hbm %s6910_s11, 32 }
 0x6c5   : > { %p6039_p0 = scmp.ne.s32.totalorder %s6857_s29, %s6038_s28  ;;  %p6043_p10 = scmp.lt.u32.totalorder %s6857_s29, %s6910_s11 }
 0x6c6   : > { %p6044_p12 = scmp.lt.u32.totalorder %s6042_s24, %s6038_s28  ;;  %p6046_p2 = scmp.lt.u32.totalorder %s6038_s28, %s6857_s29 }
 0x6c7   : > { %p6040_p6 = pnand %p6039_p0, %p6940_p3 }
 0x6c8   : > { %p6045_p1 = por %p6044_p12, %p6043_p10 }
 0x6c9   : > { %p6041_p9 = pneg %p6040_p6 }
 0x6ca   : > { %p6047_p4 = por %p6046_p2, %p6045_p1 }
 0x6cc   : > { %p6048_p7 = pnand %p6047_p4, %p6041_p9 }
 0x6ce   : > { %6051 = shalt.err (!%p6048_p7)
}
 0x6cf   : > { %5487 = dma.vmem_to_hbm [thread:$0]  (%p6940_p3), %s6859_s22, 16, %s6857_s29, %s4617_s13  }
 0x6d0 PF: > { %s6941_s16 = sld [smem:[#allocation17_spill]]  ;;  %s6942_s12 = sld [smem:[#allocation15_spill]] }
 0x6d1   : > { %s6943_s15 = sld [smem:[#allocation20_spill]] }
 0x6d6   : > { %p5514_p8 = scmp.ge.s32.totalorder %s6941_s16, 2  ;;  %s4641_s3 = sand.u32 1, %s6942_s12  }
 0x6d7   : > { %p6944_p11 = scmp.ne.s32.totalorder %s6943_s15, 0  ;;  %s4642_s23 = scalar_lea.sflag [#allocation4], %s4641_s3 }
 0x6d9   : > { %p5503_p13 = pnand %p5514_p8, %p6944_p11 }
 0x6db   : > { %6081 = dma.done.wait (!%p5503_p13), %s4642_s23, 16  }
 0x6dc   : > { %6083 = vsyncadd (!%p5503_p13), %s4642_s23, 4294967280  ;;  %s6945_s20 = sld [smem:[#allocation18_spill]]  ;;  %s6946_s21 = sld [smem:[#allocation16_spill]] }
 0x6dd   : > { %s6947_s19 = sld [smem:[#allocation19_spill]]  ;;  %s6948_s17 = smov %s6090_s18 }
 0x6e2   : > { %p24_p5 = scmp.ge.s32.totalorder %s6945_s20, 4   ;;  %s6949_s18 = smov %s6946_s21 }
 0x6e4   :  { %26 = sbr.rel (!%p24_p5) target bundleno = 8 (0x8), region = 130 }
 0x6eb   :  { %4646 = vsyncpa [#allocation3], 1 }
 0x6ec   :  { %4648 = vsyncpa [#allocation3 + $0x1], 1 }
 0x6ed   :  { %4649 = vsyncpa [#allocation6], 1 }
 0x6ee   :  { %4650 = vsyncpa [#allocation9], 1 }
 0x6ef   :  { %4651 = vsyncpa [#allocation4], 1 }
 0x6f0   :  { %4653 = vsyncpa [#allocation4 + $0x1], 1 }

</bundles_post_ra>
